<compile_context>
chip_gen: v6e
topology: v6e:2x2x1
jax: 0.10.0
libtpu: 0.0.40
codegen_flags: <defaults>
</compile_context>

<pallas_src>
import functools

import jax
import jax.numpy as jnp
from jax import lax
from jax.experimental import pallas as pl
from jax.experimental.pallas import tpu as pltpu


# ----------------------------------------------------------------------------
# Single fused, gridless Pallas kernel:
#   node embedding (collapsed) -> depth x ( relu( sum_k A_k @ (h @ W_k) + sum_k b_k ) )
#   -> per-graph max pool -> Linear(D,D) -> ReLU -> Linear(D,1)
# ----------------------------------------------------------------------------
def _gcn_fused_kernel(x_ref, nw_ref, nb_ref, nww_ref, nbw_ref, a_ref, w_ref,
                      bsum_ref, o1w_ref, o1b_ref, o2w_ref, o2b_ref, out_ref,
                      *, depth, num_convs, graph_deg, num_graphs, use_bf16):
    f32 = jnp.float32
    mxu_dt = jnp.bfloat16 if use_bf16 else f32   # MXU operand dtype; accumulation is f32

    n_nodes = x_ref.shape[0]
    d = w_ref.shape[-1]

    x = x_ref[...]                                # [N, 1]
    bsum = bsum_ref[...]                          # [1, D] = sum_k conv_b[k]

    def conv_layer(h, first):
        """relu( sum_k A_k @ XW_k + sum_k b_k ); elementwise stays f32 (VPU)."""
        def body(k, acc):
            if first:
                # h0 @ W_k == x @ (node_w @ W_k) + node_b @ W_k  (rank-2 collapse, VPU only)
                xw = x * nww_ref[k] + nbw_ref[k]                             # [N, D]
            else:
                xw = jnp.dot(h.astype(mxu_dt), w_ref[k].astype(mxu_dt),
                             preferred_element_type=f32)                     # [N, D]
            return acc + jnp.dot(a_ref[k].astype(mxu_dt), xw.astype(mxu_dt),
                                 preferred_element_type=f32)                  # [N, D]

        acc = lax.fori_loop(0, num_convs, body,
                            jnp.zeros((n_nodes, d), f32), unroll=True)
        return jnp.maximum(acc + bsum, 0.0)

    if depth == 0:
        h = x * nw_ref[...] + nb_ref[...]         # plain node embedding, no conv layers
    else:
        h = conv_layer(None, first=True)
        for _ in range(depth - 1):
            h = conv_layer(h, first=False)

    # Vectorized readout: per-graph max pool -> one batched matmul pair -> single store.
    pooled = jnp.max(jnp.reshape(h, (num_graphs, graph_deg, d)), axis=1)      # [B, D]
    h1 = jnp.dot(pooled.astype(mxu_dt), o1w_ref[...].astype(mxu_dt),
                 preferred_element_type=f32) + o1b_ref[...]
    h1 = jnp.maximum(h1, 0.0)                                                 # [B, D]
    out = jnp.dot(h1.astype(mxu_dt), o2w_ref[...].astype(mxu_dt),
                  preferred_element_type=f32) + o2b_ref[...]                  # [B, 1]
    out_ref[...] = out


def gcn_single_forward(params, x, adjs, depth, graph_deg, use_bf16=False):
    n = x.shape[0]
    d = params["node_w"].shape[1]
    k = adjs.shape[0]
    b = n // graph_deg

    # Biases of the K convs all add to the same sum -> pre-sum once (exact).
    b_sum = jnp.sum(params["conv_b"], axis=0)                                 # [1, D]
    # Rank-2 collapse of the first layer's feature transform.
    nw_w = jnp.einsum("od,kdm->kom", params["node_w"], params["conv_w"])      # [K, 1, D]
    nb_w = jnp.einsum("od,kdm->kom", params["node_b"], params["conv_w"])      # [K, 1, D]

    kernel = functools.partial(
        _gcn_fused_kernel, depth=depth, num_convs=k,
        graph_deg=graph_deg, num_graphs=b, use_bf16=use_bf16)

    args = (x, params["node_w"], params["node_b"], nw_w, nb_w, adjs,
            params["conv_w"], b_sum, params["out1_w"], params["out1_b"],
            params["out2_w"], params["out2_b"])

    # Advisory cost hint (tiny kernel; avoids pessimistic scheduling around the call).
    conv_flops = 2 * k * n * n * d * depth
    if depth >= 1:
        conv_flops += 2 * k * n * d * d * (depth - 1)
    readout_flops = 2 * b * d * d + 2 * b * d
    bytes_accessed = 4 * (sum(int(a.size) for a in args) + b)
    cost = pl.CostEstimate(flops=int(conv_flops + readout_flops),
                           transcendentals=0,
                           bytes_accessed=int(bytes_accessed))

    vmem = pltpu.MemorySpace.VMEM
    return pl.pallas_call(
        kernel,
        out_shape=jax.ShapeDtypeStruct((b, 1), jnp.float32),
        in_specs=[pl.BlockSpec(memory_space=vmem) for _ in args],
        out_specs=pl.BlockSpec(memory_space=vmem),
        cost_estimate=cost,
    )(*args)


# One XLA dispatch for the whole forward.
gcn_single_forward_jit = jax.jit(
    gcn_single_forward, static_argnames=("depth", "graph_deg", "use_bf16"))


# ----------------------------------------------------------------------------
# Pure-JAX reference (mirrors the PyTorch module op-for-op) — correctness check only.
# ----------------------------------------------------------------------------
def gcn_single_reference(params, x, adjs, depth, graph_deg):
    hi = jax.lax.Precision.HIGHEST
    h = x @ params["node_w"] + params["node_b"]
    for _ in range(depth):
        acc = jnp.zeros_like(h)
        for kk in range(adjs.shape[0]):
            xw = jnp.dot(h, params["conv_w"][kk], precision=hi)
            acc = acc + jnp.dot(adjs[kk], xw, precision=hi) + params["conv_b"][kk]
        h = jax.nn.relu(acc)
    b = x.shape[0] // graph_deg
    pooled = jnp.max(h.reshape(b, graph_deg, -1), axis=1)
    h1 = jax.nn.relu(jnp.dot(pooled, params["out1_w"], precision=hi) + params["out1_b"])
    return jnp.dot(h1, params["out2_w"], precision=hi) + params["out2_b"]


# ----------------------------------------------------------------------------
# JAX glue: PyG gcn_norm -> dense normalized adjacency (with self-loops)
# ----------------------------------------------------------------------------
def norm_adj(edge_index, mask, num_nodes, reverse=False):
    src = edge_index[0]
    dst = edge_index[1]
    if reverse:  # edge_index_b[[1, 0]] = edge_index  (swap source/target)
        src, dst = dst, src
    w = mask.astype(jnp.float32)
    a = jnp.zeros((num_nodes, num_nodes), jnp.float32)
    a = a.at[dst, src].add(w)                      # A[target, source]
    a = a + jnp.eye(num_nodes, dtype=jnp.float32)  # add self-loops
    deg = jnp.sum(a, axis=1)                       # in-degree incl. self-loop
    dinv = jnp.where(deg > 0, 1.0 / jnp.sqrt(deg), 0.0)
    return a * dinv[:, None] * dinv[None, :]


def build_adjacencies(edge_index, edge_types, num_nodes, direction):
    """Stack of normalized adjacencies, one per active GCNConv, in the same order the
    module accumulates them: conv1, then per type t in (2,3,4,5): forward, backward."""
    adjs = [norm_adj(edge_index, edge_types == 1, num_nodes, reverse=False)]
    for t, dchar in zip((2, 3, 4, 5), direction):
        m = edge_types == t
        if dchar in ("F", "2"):
            adjs.append(norm_adj(edge_index, m, num_nodes, reverse=False))
        if dchar in ("B", "2"):
            adjs.append(norm_adj(edge_index, m, num_nodes, reverse=True))
    return jnp.stack(adjs, axis=0)


# ----------------------------------------------------------------------------
# Parameter setup (deterministic glorot-uniform weights, zero biases like the module)
# ----------------------------------------------------------------------------
def glorot(key, shape):
    fan_in, fan_out = shape[0], shape[1]
    a = (6.0 / (fan_in + fan_out)) ** 0.5
    return jax.random.uniform(key, shape, jnp.float32, -a, a)


def init_params(key, node_dim, num_convs):
    keys = jax.random.split(key, num_convs + 3)
    conv_w = jnp.stack([glorot(keys[i], (node_dim, node_dim)) for i in range(num_convs)])
    conv_b = jnp.zeros((num_convs, 1, node_dim), jnp.float32)
    return {
        "node_w": glorot(keys[num_convs], (1, node_dim)),
        "node_b": jnp.zeros((1, node_dim), jnp.float32),
        "conv_w": conv_w,                 # same weights reused every depth iteration,
        "conv_b": conv_b,                 # matching the module's weight sharing.
        "out1_w": glorot(keys[num_convs + 1], (node_dim, node_dim)),
        "out1_b": jnp.zeros((1, node_dim), jnp.float32),
        "out2_w": glorot(keys[num_convs + 2], (node_dim, 1)),
        "out2_b": jnp.zeros((1, 1), jnp.float32),
    }
    # TODO(synk): edge_linear from __init__ is never used in forward(), so it is omitted.


# ----------------------------------------------------------------------------
# Main
# ----------------------------------------------------------------------------
if __name__ == "__main__":
    # Module hyper-parameters (small, consistent with the forward pass)
    num_edge_types = 5
    graph_deg = 8
    depth = 3
    node_dim = 32
    direction = "2222"   # both directions for types 2..5 -> 1 + 2*4 = 9 convs
    num_graphs = 4
    num_nodes = num_graphs * graph_deg

    key = jax.random.PRNGKey(0)
    k_x, k_types, k_params = jax.random.split(key, 3)

    # Synthetic batched graph: per-graph ring + one chord, random edge types in 1..5
    srcs, dsts = [], []
    for g in range(num_graphs):
        off = g * graph_deg
        for i in range(graph_deg):
            srcs.append(off + i)
            dsts.append(off + (i + 1) % graph_deg)
        srcs.append(off)
        dsts.append(off + graph_deg // 2)
    edge_index = jnp.array([srcs, dsts], dtype=jnp.int32)      # [2, E]
    num_edges = edge_index.shape[1]
    edge_types = jax.random.randint(k_types, (num_edges,), 1, num_edge_types + 1)

    # Node features: data.x has shape [N, 1] (Linear(1, node_dim) in the module)
    x = jax.random.normal(k_x, (num_nodes, 1), jnp.float32)

    adjs = build_adjacencies(edge_index, edge_types, num_nodes, direction)  # [K, N, N]
    params = init_params(k_params, node_dim, adjs.shape[0])

    out = gcn_single_forward_jit(params, x, adjs, depth=depth, graph_deg=graph_deg)
    out = jax.block_until_ready(out)                                        # [num_graphs, 1]

    ref = gcn_single_reference(params, x, adjs, depth, graph_deg)

    assert out.shape == (num_graphs, 1)
    assert jnp.all(jnp.isfinite(out))
    assert jnp.allclose(out, ref, rtol=1e-3, atol=1e-3), (out, ref)
    print("KERNEL_OK")
</pallas_src>

<mosaic_0001>
module attributes {stable_mosaic.version = 11 : i64} {
  func.func @_gcn_fused_kernel(%arg0: memref<32x1xf32, #tpu.memory_space<vmem>>, %arg1: memref<1x32xf32, #tpu.memory_space<vmem>>, %arg2: memref<1x32xf32, #tpu.memory_space<vmem>>, %arg3: memref<9x1x32xf32, #tpu.memory_space<vmem>>, %arg4: memref<9x1x32xf32, #tpu.memory_space<vmem>>, %arg5: memref<9x32x32xf32, #tpu.memory_space<vmem>>, %arg6: memref<9x32x32xf32, #tpu.memory_space<vmem>>, %arg7: memref<1x32xf32, #tpu.memory_space<vmem>>, %arg8: memref<32x32xf32, #tpu.memory_space<vmem>>, %arg9: memref<1x32xf32, #tpu.memory_space<vmem>>, %arg10: memref<32x1xf32, #tpu.memory_space<vmem>>, %arg11: memref<1x1xf32, #tpu.memory_space<vmem>>, %arg12: memref<4x1xf32, #tpu.memory_space<vmem>>) attributes {dimension_semantics = [], scalar_prefetch = 0 : i64, scratch_operands = 0 : i64, tpu.core_type = #tpu.core_type<tc>} {
    %c0 = arith.constant 0 : index
    %c0_0 = arith.constant 0 : index
    %0 = vector.load %arg0[%c0, %c0_0] : memref<32x1xf32, #tpu.memory_space<vmem>>, vector<32x1xf32>
    %c0_1 = arith.constant 0 : index
    %c0_2 = arith.constant 0 : index
    %1 = vector.load %arg7[%c0_1, %c0_2] : memref<1x32xf32, #tpu.memory_space<vmem>>, vector<1x32xf32>
    %cst = arith.constant 0.000000e+00 : f32
    %2 = vector.broadcast %cst : f32 to vector<32x32xf32>
    %c0_i32 = arith.constant 0 : i32
    %3 = arith.index_cast %c0_i32 : i32 to index
    %c0_3 = arith.constant 0 : index
    %c0_4 = arith.constant 0 : index
    %4 = vector.load %arg3[%3, %c0_3, %c0_4] : memref<9x1x32xf32, #tpu.memory_space<vmem>>, vector<1x1x32xf32>
    %5 = vector.shape_cast %4 : vector<1x1x32xf32> to vector<1x32xf32>
    %6 = vector.broadcast %0 : vector<32x1xf32> to vector<32x32xf32>
    %7 = vector.broadcast %5 : vector<1x32xf32> to vector<32x32xf32>
    %8 = arith.mulf %6, %7 : vector<32x32xf32>
    %9 = arith.index_cast %c0_i32 : i32 to index
    %c0_5 = arith.constant 0 : index
    %c0_6 = arith.constant 0 : index
    %10 = vector.load %arg4[%9, %c0_5, %c0_6] : memref<9x1x32xf32, #tpu.memory_space<vmem>>, vector<1x1x32xf32>
    %11 = vector.shape_cast %10 : vector<1x1x32xf32> to vector<1x32xf32>
    %12 = vector.broadcast %11 : vector<1x32xf32> to vector<32x32xf32>
    %13 = arith.addf %8, %12 : vector<32x32xf32>
    %14 = arith.index_cast %c0_i32 : i32 to index
    %c0_7 = arith.constant 0 : index
    %c0_8 = arith.constant 0 : index
    %15 = vector.load %arg5[%14, %c0_7, %c0_8] : memref<9x32x32xf32, #tpu.memory_space<vmem>>, vector<1x32x32xf32>
    %16 = vector.shape_cast %15 : vector<1x32x32xf32> to vector<32x32xf32>
    %cst_9 = arith.constant dense<0.000000e+00> : vector<32x32xf32>
    %17 = tpu.matmul %16, %13, %cst_9 {dimension_numbers = #tpu.dot_dimension_numbers<[1], [0], [0], [1], [0, 0, 1, 1], [], []>} : vector<32x32xf32>, vector<32x32xf32>, vector<32x32xf32> -> vector<32x32xf32>
    %18 = arith.addf %2, %17 : vector<32x32xf32>
    %c1_i32 = arith.constant 1 : i32
    %19 = arith.index_cast %c1_i32 : i32 to index
    %c0_10 = arith.constant 0 : index
    %c0_11 = arith.constant 0 : index
    %20 = vector.load %arg3[%19, %c0_10, %c0_11] : memref<9x1x32xf32, #tpu.memory_space<vmem>>, vector<1x1x32xf32>
    %21 = vector.shape_cast %20 : vector<1x1x32xf32> to vector<1x32xf32>
    %22 = vector.broadcast %0 : vector<32x1xf32> to vector<32x32xf32>
    %23 = vector.broadcast %21 : vector<1x32xf32> to vector<32x32xf32>
    %24 = arith.mulf %22, %23 : vector<32x32xf32>
    %25 = arith.index_cast %c1_i32 : i32 to index
    %c0_12 = arith.constant 0 : index
    %c0_13 = arith.constant 0 : index
    %26 = vector.load %arg4[%25, %c0_12, %c0_13] : memref<9x1x32xf32, #tpu.memory_space<vmem>>, vector<1x1x32xf32>
    %27 = vector.shape_cast %26 : vector<1x1x32xf32> to vector<1x32xf32>
    %28 = vector.broadcast %27 : vector<1x32xf32> to vector<32x32xf32>
    %29 = arith.addf %24, %28 : vector<32x32xf32>
    %30 = arith.index_cast %c1_i32 : i32 to index
    %c0_14 = arith.constant 0 : index
    %c0_15 = arith.constant 0 : index
    %31 = vector.load %arg5[%30, %c0_14, %c0_15] : memref<9x32x32xf32, #tpu.memory_space<vmem>>, vector<1x32x32xf32>
    %32 = vector.shape_cast %31 : vector<1x32x32xf32> to vector<32x32xf32>
    %cst_16 = arith.constant dense<0.000000e+00> : vector<32x32xf32>
    %33 = tpu.matmul %32, %29, %cst_16 {dimension_numbers = #tpu.dot_dimension_numbers<[1], [0], [0], [1], [0, 0, 1, 1], [], []>} : vector<32x32xf32>, vector<32x32xf32>, vector<32x32xf32> -> vector<32x32xf32>
    %34 = arith.addf %18, %33 : vector<32x32xf32>
    %c2_i32 = arith.constant 2 : i32
    %35 = arith.index_cast %c2_i32 : i32 to index
    %c0_17 = arith.constant 0 : index
    %c0_18 = arith.constant 0 : index
    %36 = vector.load %arg3[%35, %c0_17, %c0_18] : memref<9x1x32xf32, #tpu.memory_space<vmem>>, vector<1x1x32xf32>
    %37 = vector.shape_cast %36 : vector<1x1x32xf32> to vector<1x32xf32>
    %38 = vector.broadcast %0 : vector<32x1xf32> to vector<32x32xf32>
    %39 = vector.broadcast %37 : vector<1x32xf32> to vector<32x32xf32>
    %40 = arith.mulf %38, %39 : vector<32x32xf32>
    %41 = arith.index_cast %c2_i32 : i32 to index
    %c0_19 = arith.constant 0 : index
    %c0_20 = arith.constant 0 : index
    %42 = vector.load %arg4[%41, %c0_19, %c0_20] : memref<9x1x32xf32, #tpu.memory_space<vmem>>, vector<1x1x32xf32>
    %43 = vector.shape_cast %42 : vector<1x1x32xf32> to vector<1x32xf32>
    %44 = vector.broadcast %43 : vector<1x32xf32> to vector<32x32xf32>
    %45 = arith.addf %40, %44 : vector<32x32xf32>
    %46 = arith.index_cast %c2_i32 : i32 to index
    %c0_21 = arith.constant 0 : index
    %c0_22 = arith.constant 0 : index
    %47 = vector.load %arg5[%46, %c0_21, %c0_22] : memref<9x32x32xf32, #tpu.memory_space<vmem>>, vector<1x32x32xf32>
    %48 = vector.shape_cast %47 : vector<1x32x32xf32> to vector<32x32xf32>
    %cst_23 = arith.constant dense<0.000000e+00> : vector<32x32xf32>
    %49 = tpu.matmul %48, %45, %cst_23 {dimension_numbers = #tpu.dot_dimension_numbers<[1], [0], [0], [1], [0, 0, 1, 1], [], []>} : vector<32x32xf32>, vector<32x32xf32>, vector<32x32xf32> -> vector<32x32xf32>
    %50 = arith.addf %34, %49 : vector<32x32xf32>
    %c3_i32 = arith.constant 3 : i32
    %51 = arith.index_cast %c3_i32 : i32 to index
    %c0_24 = arith.constant 0 : index
    %c0_25 = arith.constant 0 : index
    %52 = vector.load %arg3[%51, %c0_24, %c0_25] : memref<9x1x32xf32, #tpu.memory_space<vmem>>, vector<1x1x32xf32>
    %53 = vector.shape_cast %52 : vector<1x1x32xf32> to vector<1x32xf32>
    %54 = vector.broadcast %0 : vector<32x1xf32> to vector<32x32xf32>
    %55 = vector.broadcast %53 : vector<1x32xf32> to vector<32x32xf32>
    %56 = arith.mulf %54, %55 : vector<32x32xf32>
    %57 = arith.index_cast %c3_i32 : i32 to index
    %c0_26 = arith.constant 0 : index
    %c0_27 = arith.constant 0 : index
    %58 = vector.load %arg4[%57, %c0_26, %c0_27] : memref<9x1x32xf32, #tpu.memory_space<vmem>>, vector<1x1x32xf32>
    %59 = vector.shape_cast %58 : vector<1x1x32xf32> to vector<1x32xf32>
    %60 = vector.broadcast %59 : vector<1x32xf32> to vector<32x32xf32>
    %61 = arith.addf %56, %60 : vector<32x32xf32>
    %62 = arith.index_cast %c3_i32 : i32 to index
    %c0_28 = arith.constant 0 : index
    %c0_29 = arith.constant 0 : index
    %63 = vector.load %arg5[%62, %c0_28, %c0_29] : memref<9x32x32xf32, #tpu.memory_space<vmem>>, vector<1x32x32xf32>
    %64 = vector.shape_cast %63 : vector<1x32x32xf32> to vector<32x32xf32>
    %cst_30 = arith.constant dense<0.000000e+00> : vector<32x32xf32>
    %65 = tpu.matmul %64, %61, %cst_30 {dimension_numbers = #tpu.dot_dimension_numbers<[1], [0], [0], [1], [0, 0, 1, 1], [], []>} : vector<32x32xf32>, vector<32x32xf32>, vector<32x32xf32> -> vector<32x32xf32>
    %66 = arith.addf %50, %65 : vector<32x32xf32>
    %c4_i32 = arith.constant 4 : i32
    %67 = arith.index_cast %c4_i32 : i32 to index
    %c0_31 = arith.constant 0 : index
    %c0_32 = arith.constant 0 : index
    %68 = vector.load %arg3[%67, %c0_31, %c0_32] : memref<9x1x32xf32, #tpu.memory_space<vmem>>, vector<1x1x32xf32>
    %69 = vector.shape_cast %68 : vector<1x1x32xf32> to vector<1x32xf32>
    %70 = vector.broadcast %0 : vector<32x1xf32> to vector<32x32xf32>
    %71 = vector.broadcast %69 : vector<1x32xf32> to vector<32x32xf32>
    %72 = arith.mulf %70, %71 : vector<32x32xf32>
    %73 = arith.index_cast %c4_i32 : i32 to index
    %c0_33 = arith.constant 0 : index
    %c0_34 = arith.constant 0 : index
    %74 = vector.load %arg4[%73, %c0_33, %c0_34] : memref<9x1x32xf32, #tpu.memory_space<vmem>>, vector<1x1x32xf32>
    %75 = vector.shape_cast %74 : vector<1x1x32xf32> to vector<1x32xf32>
    %76 = vector.broadcast %75 : vector<1x32xf32> to vector<32x32xf32>
    %77 = arith.addf %72, %76 : vector<32x32xf32>
    %78 = arith.index_cast %c4_i32 : i32 to index
    %c0_35 = arith.constant 0 : index
    %c0_36 = arith.constant 0 : index
    %79 = vector.load %arg5[%78, %c0_35, %c0_36] : memref<9x32x32xf32, #tpu.memory_space<vmem>>, vector<1x32x32xf32>
    %80 = vector.shape_cast %79 : vector<1x32x32xf32> to vector<32x32xf32>
    %cst_37 = arith.constant dense<0.000000e+00> : vector<32x32xf32>
    %81 = tpu.matmul %80, %77, %cst_37 {dimension_numbers = #tpu.dot_dimension_numbers<[1], [0], [0], [1], [0, 0, 1, 1], [], []>} : vector<32x32xf32>, vector<32x32xf32>, vector<32x32xf32> -> vector<32x32xf32>
    %82 = arith.addf %66, %81 : vector<32x32xf32>
    %c5_i32 = arith.constant 5 : i32
    %83 = arith.index_cast %c5_i32 : i32 to index
    %c0_38 = arith.constant 0 : index
    %c0_39 = arith.constant 0 : index
    %84 = vector.load %arg3[%83, %c0_38, %c0_39] : memref<9x1x32xf32, #tpu.memory_space<vmem>>, vector<1x1x32xf32>
    %85 = vector.shape_cast %84 : vector<1x1x32xf32> to vector<1x32xf32>
    %86 = vector.broadcast %0 : vector<32x1xf32> to vector<32x32xf32>
    %87 = vector.broadcast %85 : vector<1x32xf32> to vector<32x32xf32>
    %88 = arith.mulf %86, %87 : vector<32x32xf32>
    %89 = arith.index_cast %c5_i32 : i32 to index
    %c0_40 = arith.constant 0 : index
    %c0_41 = arith.constant 0 : index
    %90 = vector.load %arg4[%89, %c0_40, %c0_41] : memref<9x1x32xf32, #tpu.memory_space<vmem>>, vector<1x1x32xf32>
    %91 = vector.shape_cast %90 : vector<1x1x32xf32> to vector<1x32xf32>
    %92 = vector.broadcast %91 : vector<1x32xf32> to vector<32x32xf32>
    %93 = arith.addf %88, %92 : vector<32x32xf32>
    %94 = arith.index_cast %c5_i32 : i32 to index
    %c0_42 = arith.constant 0 : index
    %c0_43 = arith.constant 0 : index
    %95 = vector.load %arg5[%94, %c0_42, %c0_43] : memref<9x32x32xf32, #tpu.memory_space<vmem>>, vector<1x32x32xf32>
    %96 = vector.shape_cast %95 : vector<1x32x32xf32> to vector<32x32xf32>
    %cst_44 = arith.constant dense<0.000000e+00> : vector<32x32xf32>
    %97 = tpu.matmul %96, %93, %cst_44 {dimension_numbers = #tpu.dot_dimension_numbers<[1], [0], [0], [1], [0, 0, 1, 1], [], []>} : vector<32x32xf32>, vector<32x32xf32>, vector<32x32xf32> -> vector<32x32xf32>
    %98 = arith.addf %82, %97 : vector<32x32xf32>
    %c6_i32 = arith.constant 6 : i32
    %99 = arith.index_cast %c6_i32 : i32 to index
    %c0_45 = arith.constant 0 : index
    %c0_46 = arith.constant 0 : index
    %100 = vector.load %arg3[%99, %c0_45, %c0_46] : memref<9x1x32xf32, #tpu.memory_space<vmem>>, vector<1x1x32xf32>
    %101 = vector.shape_cast %100 : vector<1x1x32xf32> to vector<1x32xf32>
    %102 = vector.broadcast %0 : vector<32x1xf32> to vector<32x32xf32>
    %103 = vector.broadcast %101 : vector<1x32xf32> to vector<32x32xf32>
    %104 = arith.mulf %102, %103 : vector<32x32xf32>
    %105 = arith.index_cast %c6_i32 : i32 to index
    %c0_47 = arith.constant 0 : index
    %c0_48 = arith.constant 0 : index
    %106 = vector.load %arg4[%105, %c0_47, %c0_48] : memref<9x1x32xf32, #tpu.memory_space<vmem>>, vector<1x1x32xf32>
    %107 = vector.shape_cast %106 : vector<1x1x32xf32> to vector<1x32xf32>
    %108 = vector.broadcast %107 : vector<1x32xf32> to vector<32x32xf32>
    %109 = arith.addf %104, %108 : vector<32x32xf32>
    %110 = arith.index_cast %c6_i32 : i32 to index
    %c0_49 = arith.constant 0 : index
    %c0_50 = arith.constant 0 : index
    %111 = vector.load %arg5[%110, %c0_49, %c0_50] : memref<9x32x32xf32, #tpu.memory_space<vmem>>, vector<1x32x32xf32>
    %112 = vector.shape_cast %111 : vector<1x32x32xf32> to vector<32x32xf32>
    %cst_51 = arith.constant dense<0.000000e+00> : vector<32x32xf32>
    %113 = tpu.matmul %112, %109, %cst_51 {dimension_numbers = #tpu.dot_dimension_numbers<[1], [0], [0], [1], [0, 0, 1, 1], [], []>} : vector<32x32xf32>, vector<32x32xf32>, vector<32x32xf32> -> vector<32x32xf32>
    %114 = arith.addf %98, %113 : vector<32x32xf32>
    %c7_i32 = arith.constant 7 : i32
    %115 = arith.index_cast %c7_i32 : i32 to index
    %c0_52 = arith.constant 0 : index
    %c0_53 = arith.constant 0 : index
    %116 = vector.load %arg3[%115, %c0_52, %c0_53] : memref<9x1x32xf32, #tpu.memory_space<vmem>>, vector<1x1x32xf32>
    %117 = vector.shape_cast %116 : vector<1x1x32xf32> to vector<1x32xf32>
    %118 = vector.broadcast %0 : vector<32x1xf32> to vector<32x32xf32>
    %119 = vector.broadcast %117 : vector<1x32xf32> to vector<32x32xf32>
    %120 = arith.mulf %118, %119 : vector<32x32xf32>
    %121 = arith.index_cast %c7_i32 : i32 to index
    %c0_54 = arith.constant 0 : index
    %c0_55 = arith.constant 0 : index
    %122 = vector.load %arg4[%121, %c0_54, %c0_55] : memref<9x1x32xf32, #tpu.memory_space<vmem>>, vector<1x1x32xf32>
    %123 = vector.shape_cast %122 : vector<1x1x32xf32> to vector<1x32xf32>
    %124 = vector.broadcast %123 : vector<1x32xf32> to vector<32x32xf32>
    %125 = arith.addf %120, %124 : vector<32x32xf32>
    %126 = arith.index_cast %c7_i32 : i32 to index
    %c0_56 = arith.constant 0 : index
    %c0_57 = arith.constant 0 : index
    %127 = vector.load %arg5[%126, %c0_56, %c0_57] : memref<9x32x32xf32, #tpu.memory_space<vmem>>, vector<1x32x32xf32>
    %128 = vector.shape_cast %127 : vector<1x32x32xf32> to vector<32x32xf32>
    %cst_58 = arith.constant dense<0.000000e+00> : vector<32x32xf32>
    %129 = tpu.matmul %128, %125, %cst_58 {dimension_numbers = #tpu.dot_dimension_numbers<[1], [0], [0], [1], [0, 0, 1, 1], [], []>} : vector<32x32xf32>, vector<32x32xf32>, vector<32x32xf32> -> vector<32x32xf32>
    %130 = arith.addf %114, %129 : vector<32x32xf32>
    %c8_i32 = arith.constant 8 : i32
    %131 = arith.index_cast %c8_i32 : i32 to index
    %c0_59 = arith.constant 0 : index
    %c0_60 = arith.constant 0 : index
    %132 = vector.load %arg3[%131, %c0_59, %c0_60] : memref<9x1x32xf32, #tpu.memory_space<vmem>>, vector<1x1x32xf32>
    %133 = vector.shape_cast %132 : vector<1x1x32xf32> to vector<1x32xf32>
    %134 = vector.broadcast %0 : vector<32x1xf32> to vector<32x32xf32>
    %135 = vector.broadcast %133 : vector<1x32xf32> to vector<32x32xf32>
    %136 = arith.mulf %134, %135 : vector<32x32xf32>
    %137 = arith.index_cast %c8_i32 : i32 to index
    %c0_61 = arith.constant 0 : index
    %c0_62 = arith.constant 0 : index
    %138 = vector.load %arg4[%137, %c0_61, %c0_62] : memref<9x1x32xf32, #tpu.memory_space<vmem>>, vector<1x1x32xf32>
    %139 = vector.shape_cast %138 : vector<1x1x32xf32> to vector<1x32xf32>
    %140 = vector.broadcast %139 : vector<1x32xf32> to vector<32x32xf32>
    %141 = arith.addf %136, %140 : vector<32x32xf32>
    %142 = arith.index_cast %c8_i32 : i32 to index
    %c0_63 = arith.constant 0 : index
    %c0_64 = arith.constant 0 : index
    %143 = vector.load %arg5[%142, %c0_63, %c0_64] : memref<9x32x32xf32, #tpu.memory_space<vmem>>, vector<1x32x32xf32>
    %144 = vector.shape_cast %143 : vector<1x32x32xf32> to vector<32x32xf32>
    %cst_65 = arith.constant dense<0.000000e+00> : vector<32x32xf32>
    %145 = tpu.matmul %144, %141, %cst_65 {dimension_numbers = #tpu.dot_dimension_numbers<[1], [0], [0], [1], [0, 0, 1, 1], [], []>} : vector<32x32xf32>, vector<32x32xf32>, vector<32x32xf32> -> vector<32x32xf32>
    %146 = arith.addf %130, %145 : vector<32x32xf32>
    %c9_i32 = arith.constant 9 : i32
    %147 = vector.broadcast %1 : vector<1x32xf32> to vector<32x32xf32>
    %148 = arith.addf %146, %147 : vector<32x32xf32>
    %cst_66 = arith.constant 0.000000e+00 : f32
    %149 = vector.broadcast %cst_66 : f32 to vector<32x32xf32>
    %150 = arith.maximumf %148, %149 : vector<32x32xf32>
    %cst_67 = arith.constant 0.000000e+00 : f32
    %151 = vector.broadcast %cst_67 : f32 to vector<32x32xf32>
    %c0_i32_68 = arith.constant 0 : i32
    %152 = arith.index_cast %c0_i32_68 : i32 to index
    %c0_69 = arith.constant 0 : index
    %c0_70 = arith.constant 0 : index
    %153 = vector.load %arg6[%152, %c0_69, %c0_70] : memref<9x32x32xf32, #tpu.memory_space<vmem>>, vector<1x32x32xf32>
    %154 = vector.shape_cast %153 : vector<1x32x32xf32> to vector<32x32xf32>
    %cst_71 = arith.constant dense<0.000000e+00> : vector<32x32xf32>
    %155 = tpu.matmul %150, %154, %cst_71 {dimension_numbers = #tpu.dot_dimension_numbers<[1], [0], [0], [1], [0, 0, 1, 1], [], []>} : vector<32x32xf32>, vector<32x32xf32>, vector<32x32xf32> -> vector<32x32xf32>
    %156 = arith.index_cast %c0_i32_68 : i32 to index
    %c0_72 = arith.constant 0 : index
    %c0_73 = arith.constant 0 : index
    %157 = vector.load %arg5[%156, %c0_72, %c0_73] : memref<9x32x32xf32, #tpu.memory_space<vmem>>, vector<1x32x32xf32>
    %158 = vector.shape_cast %157 : vector<1x32x32xf32> to vector<32x32xf32>
    %cst_74 = arith.constant dense<0.000000e+00> : vector<32x32xf32>
    %159 = tpu.matmul %158, %155, %cst_74 {dimension_numbers = #tpu.dot_dimension_numbers<[1], [0], [0], [1], [0, 0, 1, 1], [], []>} : vector<32x32xf32>, vector<32x32xf32>, vector<32x32xf32> -> vector<32x32xf32>
    %160 = arith.addf %151, %159 : vector<32x32xf32>
    %c1_i32_75 = arith.constant 1 : i32
    %161 = arith.index_cast %c1_i32_75 : i32 to index
    %c0_76 = arith.constant 0 : index
    %c0_77 = arith.constant 0 : index
    %162 = vector.load %arg6[%161, %c0_76, %c0_77] : memref<9x32x32xf32, #tpu.memory_space<vmem>>, vector<1x32x32xf32>
    %163 = vector.shape_cast %162 : vector<1x32x32xf32> to vector<32x32xf32>
    %cst_78 = arith.constant dense<0.000000e+00> : vector<32x32xf32>
    %164 = tpu.matmul %150, %163, %cst_78 {dimension_numbers = #tpu.dot_dimension_numbers<[1], [0], [0], [1], [0, 0, 1, 1], [], []>} : vector<32x32xf32>, vector<32x32xf32>, vector<32x32xf32> -> vector<32x32xf32>
    %165 = arith.index_cast %c1_i32_75 : i32 to index
    %c0_79 = arith.constant 0 : index
    %c0_80 = arith.constant 0 : index
    %166 = vector.load %arg5[%165, %c0_79, %c0_80] : memref<9x32x32xf32, #tpu.memory_space<vmem>>, vector<1x32x32xf32>
    %167 = vector.shape_cast %166 : vector<1x32x32xf32> to vector<32x32xf32>
    %cst_81 = arith.constant dense<0.000000e+00> : vector<32x32xf32>
    %168 = tpu.matmul %167, %164, %cst_81 {dimension_numbers = #tpu.dot_dimension_numbers<[1], [0], [0], [1], [0, 0, 1, 1], [], []>} : vector<32x32xf32>, vector<32x32xf32>, vector<32x32xf32> -> vector<32x32xf32>
    %169 = arith.addf %160, %168 : vector<32x32xf32>
    %c2_i32_82 = arith.constant 2 : i32
    %170 = arith.index_cast %c2_i32_82 : i32 to index
    %c0_83 = arith.constant 0 : index
    %c0_84 = arith.constant 0 : index
    %171 = vector.load %arg6[%170, %c0_83, %c0_84] : memref<9x32x32xf32, #tpu.memory_space<vmem>>, vector<1x32x32xf32>
    %172 = vector.shape_cast %171 : vector<1x32x32xf32> to vector<32x32xf32>
    %cst_85 = arith.constant dense<0.000000e+00> : vector<32x32xf32>
    %173 = tpu.matmul %150, %172, %cst_85 {dimension_numbers = #tpu.dot_dimension_numbers<[1], [0], [0], [1], [0, 0, 1, 1], [], []>} : vector<32x32xf32>, vector<32x32xf32>, vector<32x32xf32> -> vector<32x32xf32>
    %174 = arith.index_cast %c2_i32_82 : i32 to index
    %c0_86 = arith.constant 0 : index
    %c0_87 = arith.constant 0 : index
    %175 = vector.load %arg5[%174, %c0_86, %c0_87] : memref<9x32x32xf32, #tpu.memory_space<vmem>>, vector<1x32x32xf32>
    %176 = vector.shape_cast %175 : vector<1x32x32xf32> to vector<32x32xf32>
    %cst_88 = arith.constant dense<0.000000e+00> : vector<32x32xf32>
    %177 = tpu.matmul %176, %173, %cst_88 {dimension_numbers = #tpu.dot_dimension_numbers<[1], [0], [0], [1], [0, 0, 1, 1], [], []>} : vector<32x32xf32>, vector<32x32xf32>, vector<32x32xf32> -> vector<32x32xf32>
    %178 = arith.addf %169, %177 : vector<32x32xf32>
    %c3_i32_89 = arith.constant 3 : i32
    %179 = arith.index_cast %c3_i32_89 : i32 to index
    %c0_90 = arith.constant 0 : index
    %c0_91 = arith.constant 0 : index
    %180 = vector.load %arg6[%179, %c0_90, %c0_91] : memref<9x32x32xf32, #tpu.memory_space<vmem>>, vector<1x32x32xf32>
    %181 = vector.shape_cast %180 : vector<1x32x32xf32> to vector<32x32xf32>
    %cst_92 = arith.constant dense<0.000000e+00> : vector<32x32xf32>
    %182 = tpu.matmul %150, %181, %cst_92 {dimension_numbers = #tpu.dot_dimension_numbers<[1], [0], [0], [1], [0, 0, 1, 1], [], []>} : vector<32x32xf32>, vector<32x32xf32>, vector<32x32xf32> -> vector<32x32xf32>
    %183 = arith.index_cast %c3_i32_89 : i32 to index
    %c0_93 = arith.constant 0 : index
    %c0_94 = arith.constant 0 : index
    %184 = vector.load %arg5[%183, %c0_93, %c0_94] : memref<9x32x32xf32, #tpu.memory_space<vmem>>, vector<1x32x32xf32>
    %185 = vector.shape_cast %184 : vector<1x32x32xf32> to vector<32x32xf32>
    %cst_95 = arith.constant dense<0.000000e+00> : vector<32x32xf32>
    %186 = tpu.matmul %185, %182, %cst_95 {dimension_numbers = #tpu.dot_dimension_numbers<[1], [0], [0], [1], [0, 0, 1, 1], [], []>} : vector<32x32xf32>, vector<32x32xf32>, vector<32x32xf32> -> vector<32x32xf32>
    %187 = arith.addf %178, %186 : vector<32x32xf32>
    %c4_i32_96 = arith.constant 4 : i32
    %188 = arith.index_cast %c4_i32_96 : i32 to index
    %c0_97 = arith.constant 0 : index
    %c0_98 = arith.constant 0 : index
    %189 = vector.load %arg6[%188, %c0_97, %c0_98] : memref<9x32x32xf32, #tpu.memory_space<vmem>>, vector<1x32x32xf32>
    %190 = vector.shape_cast %189 : vector<1x32x32xf32> to vector<32x32xf32>
    %cst_99 = arith.constant dense<0.000000e+00> : vector<32x32xf32>
    %191 = tpu.matmul %150, %190, %cst_99 {dimension_numbers = #tpu.dot_dimension_numbers<[1], [0], [0], [1], [0, 0, 1, 1], [], []>} : vector<32x32xf32>, vector<32x32xf32>, vector<32x32xf32> -> vector<32x32xf32>
    %192 = arith.index_cast %c4_i32_96 : i32 to index
    %c0_100 = arith.constant 0 : index
    %c0_101 = arith.constant 0 : index
    %193 = vector.load %arg5[%192, %c0_100, %c0_101] : memref<9x32x32xf32, #tpu.memory_space<vmem>>, vector<1x32x32xf32>
    %194 = vector.shape_cast %193 : vector<1x32x32xf32> to vector<32x32xf32>
    %cst_102 = arith.constant dense<0.000000e+00> : vector<32x32xf32>
    %195 = tpu.matmul %194, %191, %cst_102 {dimension_numbers = #tpu.dot_dimension_numbers<[1], [0], [0], [1], [0, 0, 1, 1], [], []>} : vector<32x32xf32>, vector<32x32xf32>, vector<32x32xf32> -> vector<32x32xf32>
    %196 = arith.addf %187, %195 : vector<32x32xf32>
    %c5_i32_103 = arith.constant 5 : i32
    %197 = arith.index_cast %c5_i32_103 : i32 to index
    %c0_104 = arith.constant 0 : index
    %c0_105 = arith.constant 0 : index
    %198 = vector.load %arg6[%197, %c0_104, %c0_105] : memref<9x32x32xf32, #tpu.memory_space<vmem>>, vector<1x32x32xf32>
    %199 = vector.shape_cast %198 : vector<1x32x32xf32> to vector<32x32xf32>
    %cst_106 = arith.constant dense<0.000000e+00> : vector<32x32xf32>
    %200 = tpu.matmul %150, %199, %cst_106 {dimension_numbers = #tpu.dot_dimension_numbers<[1], [0], [0], [1], [0, 0, 1, 1], [], []>} : vector<32x32xf32>, vector<32x32xf32>, vector<32x32xf32> -> vector<32x32xf32>
    %201 = arith.index_cast %c5_i32_103 : i32 to index
    %c0_107 = arith.constant 0 : index
    %c0_108 = arith.constant 0 : index
    %202 = vector.load %arg5[%201, %c0_107, %c0_108] : memref<9x32x32xf32, #tpu.memory_space<vmem>>, vector<1x32x32xf32>
    %203 = vector.shape_cast %202 : vector<1x32x32xf32> to vector<32x32xf32>
    %cst_109 = arith.constant dense<0.000000e+00> : vector<32x32xf32>
    %204 = tpu.matmul %203, %200, %cst_109 {dimension_numbers = #tpu.dot_dimension_numbers<[1], [0], [0], [1], [0, 0, 1, 1], [], []>} : vector<32x32xf32>, vector<32x32xf32>, vector<32x32xf32> -> vector<32x32xf32>
    %205 = arith.addf %196, %204 : vector<32x32xf32>
    %c6_i32_110 = arith.constant 6 : i32
    %206 = arith.index_cast %c6_i32_110 : i32 to index
    %c0_111 = arith.constant 0 : index
    %c0_112 = arith.constant 0 : index
    %207 = vector.load %arg6[%206, %c0_111, %c0_112] : memref<9x32x32xf32, #tpu.memory_space<vmem>>, vector<1x32x32xf32>
    %208 = vector.shape_cast %207 : vector<1x32x32xf32> to vector<32x32xf32>
    %cst_113 = arith.constant dense<0.000000e+00> : vector<32x32xf32>
    %209 = tpu.matmul %150, %208, %cst_113 {dimension_numbers = #tpu.dot_dimension_numbers<[1], [0], [0], [1], [0, 0, 1, 1], [], []>} : vector<32x32xf32>, vector<32x32xf32>, vector<32x32xf32> -> vector<32x32xf32>
    %210 = arith.index_cast %c6_i32_110 : i32 to index
    %c0_114 = arith.constant 0 : index
    %c0_115 = arith.constant 0 : index
    %211 = vector.load %arg5[%210, %c0_114, %c0_115] : memref<9x32x32xf32, #tpu.memory_space<vmem>>, vector<1x32x32xf32>
    %212 = vector.shape_cast %211 : vector<1x32x32xf32> to vector<32x32xf32>
    %cst_116 = arith.constant dense<0.000000e+00> : vector<32x32xf32>
    %213 = tpu.matmul %212, %209, %cst_116 {dimension_numbers = #tpu.dot_dimension_numbers<[1], [0], [0], [1], [0, 0, 1, 1], [], []>} : vector<32x32xf32>, vector<32x32xf32>, vector<32x32xf32> -> vector<32x32xf32>
    %214 = arith.addf %205, %213 : vector<32x32xf32>
    %c7_i32_117 = arith.constant 7 : i32
    %215 = arith.index_cast %c7_i32_117 : i32 to index
    %c0_118 = arith.constant 0 : index
    %c0_119 = arith.constant 0 : index
    %216 = vector.load %arg6[%215, %c0_118, %c0_119] : memref<9x32x32xf32, #tpu.memory_space<vmem>>, vector<1x32x32xf32>
    %217 = vector.shape_cast %216 : vector<1x32x32xf32> to vector<32x32xf32>
    %cst_120 = arith.constant dense<0.000000e+00> : vector<32x32xf32>
    %218 = tpu.matmul %150, %217, %cst_120 {dimension_numbers = #tpu.dot_dimension_numbers<[1], [0], [0], [1], [0, 0, 1, 1], [], []>} : vector<32x32xf32>, vector<32x32xf32>, vector<32x32xf32> -> vector<32x32xf32>
    %219 = arith.index_cast %c7_i32_117 : i32 to index
    %c0_121 = arith.constant 0 : index
    %c0_122 = arith.constant 0 : index
    %220 = vector.load %arg5[%219, %c0_121, %c0_122] : memref<9x32x32xf32, #tpu.memory_space<vmem>>, vector<1x32x32xf32>
    %221 = vector.shape_cast %220 : vector<1x32x32xf32> to vector<32x32xf32>
    %cst_123 = arith.constant dense<0.000000e+00> : vector<32x32xf32>
    %222 = tpu.matmul %221, %218, %cst_123 {dimension_numbers = #tpu.dot_dimension_numbers<[1], [0], [0], [1], [0, 0, 1, 1], [], []>} : vector<32x32xf32>, vector<32x32xf32>, vector<32x32xf32> -> vector<32x32xf32>
    %223 = arith.addf %214, %222 : vector<32x32xf32>
    %c8_i32_124 = arith.constant 8 : i32
    %224 = arith.index_cast %c8_i32_124 : i32 to index
    %c0_125 = arith.constant 0 : index
    %c0_126 = arith.constant 0 : index
    %225 = vector.load %arg6[%224, %c0_125, %c0_126] : memref<9x32x32xf32, #tpu.memory_space<vmem>>, vector<1x32x32xf32>
    %226 = vector.shape_cast %225 : vector<1x32x32xf32> to vector<32x32xf32>
    %cst_127 = arith.constant dense<0.000000e+00> : vector<32x32xf32>
    %227 = tpu.matmul %150, %226, %cst_127 {dimension_numbers = #tpu.dot_dimension_numbers<[1], [0], [0], [1], [0, 0, 1, 1], [], []>} : vector<32x32xf32>, vector<32x32xf32>, vector<32x32xf32> -> vector<32x32xf32>
    %228 = arith.index_cast %c8_i32_124 : i32 to index
    %c0_128 = arith.constant 0 : index
    %c0_129 = arith.constant 0 : index
    %229 = vector.load %arg5[%228, %c0_128, %c0_129] : memref<9x32x32xf32, #tpu.memory_space<vmem>>, vector<1x32x32xf32>
    %230 = vector.shape_cast %229 : vector<1x32x32xf32> to vector<32x32xf32>
    %cst_130 = arith.constant dense<0.000000e+00> : vector<32x32xf32>
    %231 = tpu.matmul %230, %227, %cst_130 {dimension_numbers = #tpu.dot_dimension_numbers<[1], [0], [0], [1], [0, 0, 1, 1], [], []>} : vector<32x32xf32>, vector<32x32xf32>, vector<32x32xf32> -> vector<32x32xf32>
    %232 = arith.addf %223, %231 : vector<32x32xf32>
    %c9_i32_131 = arith.constant 9 : i32
    %233 = vector.broadcast %1 : vector<1x32xf32> to vector<32x32xf32>
    %234 = arith.addf %232, %233 : vector<32x32xf32>
    %cst_132 = arith.constant 0.000000e+00 : f32
    %235 = vector.broadcast %cst_132 : f32 to vector<32x32xf32>
    %236 = arith.maximumf %234, %235 : vector<32x32xf32>
    %cst_133 = arith.constant 0.000000e+00 : f32
    %237 = vector.broadcast %cst_133 : f32 to vector<32x32xf32>
    %c0_i32_134 = arith.constant 0 : i32
    %238 = arith.index_cast %c0_i32_134 : i32 to index
    %c0_135 = arith.constant 0 : index
    %c0_136 = arith.constant 0 : index
    %239 = vector.load %arg6[%238, %c0_135, %c0_136] : memref<9x32x32xf32, #tpu.memory_space<vmem>>, vector<1x32x32xf32>
    %240 = vector.shape_cast %239 : vector<1x32x32xf32> to vector<32x32xf32>
    %cst_137 = arith.constant dense<0.000000e+00> : vector<32x32xf32>
    %241 = tpu.matmul %236, %240, %cst_137 {dimension_numbers = #tpu.dot_dimension_numbers<[1], [0], [0], [1], [0, 0, 1, 1], [], []>} : vector<32x32xf32>, vector<32x32xf32>, vector<32x32xf32> -> vector<32x32xf32>
    %242 = arith.index_cast %c0_i32_134 : i32 to index
    %c0_138 = arith.constant 0 : index
    %c0_139 = arith.constant 0 : index
    %243 = vector.load %arg5[%242, %c0_138, %c0_139] : memref<9x32x32xf32, #tpu.memory_space<vmem>>, vector<1x32x32xf32>
    %244 = vector.shape_cast %243 : vector<1x32x32xf32> to vector<32x32xf32>
    %cst_140 = arith.constant dense<0.000000e+00> : vector<32x32xf32>
    %245 = tpu.matmul %244, %241, %cst_140 {dimension_numbers = #tpu.dot_dimension_numbers<[1], [0], [0], [1], [0, 0, 1, 1], [], []>} : vector<32x32xf32>, vector<32x32xf32>, vector<32x32xf32> -> vector<32x32xf32>
    %246 = arith.addf %237, %245 : vector<32x32xf32>
    %c1_i32_141 = arith.constant 1 : i32
    %247 = arith.index_cast %c1_i32_141 : i32 to index
    %c0_142 = arith.constant 0 : index
    %c0_143 = arith.constant 0 : index
    %248 = vector.load %arg6[%247, %c0_142, %c0_143] : memref<9x32x32xf32, #tpu.memory_space<vmem>>, vector<1x32x32xf32>
    %249 = vector.shape_cast %248 : vector<1x32x32xf32> to vector<32x32xf32>
    %cst_144 = arith.constant dense<0.000000e+00> : vector<32x32xf32>
    %250 = tpu.matmul %236, %249, %cst_144 {dimension_numbers = #tpu.dot_dimension_numbers<[1], [0], [0], [1], [0, 0, 1, 1], [], []>} : vector<32x32xf32>, vector<32x32xf32>, vector<32x32xf32> -> vector<32x32xf32>
    %251 = arith.index_cast %c1_i32_141 : i32 to index
    %c0_145 = arith.constant 0 : index
    %c0_146 = arith.constant 0 : index
    %252 = vector.load %arg5[%251, %c0_145, %c0_146] : memref<9x32x32xf32, #tpu.memory_space<vmem>>, vector<1x32x32xf32>
    %253 = vector.shape_cast %252 : vector<1x32x32xf32> to vector<32x32xf32>
    %cst_147 = arith.constant dense<0.000000e+00> : vector<32x32xf32>
    %254 = tpu.matmul %253, %250, %cst_147 {dimension_numbers = #tpu.dot_dimension_numbers<[1], [0], [0], [1], [0, 0, 1, 1], [], []>} : vector<32x32xf32>, vector<32x32xf32>, vector<32x32xf32> -> vector<32x32xf32>
    %255 = arith.addf %246, %254 : vector<32x32xf32>
    %c2_i32_148 = arith.constant 2 : i32
    %256 = arith.index_cast %c2_i32_148 : i32 to index
    %c0_149 = arith.constant 0 : index
    %c0_150 = arith.constant 0 : index
    %257 = vector.load %arg6[%256, %c0_149, %c0_150] : memref<9x32x32xf32, #tpu.memory_space<vmem>>, vector<1x32x32xf32>
    %258 = vector.shape_cast %257 : vector<1x32x32xf32> to vector<32x32xf32>
    %cst_151 = arith.constant dense<0.000000e+00> : vector<32x32xf32>
    %259 = tpu.matmul %236, %258, %cst_151 {dimension_numbers = #tpu.dot_dimension_numbers<[1], [0], [0], [1], [0, 0, 1, 1], [], []>} : vector<32x32xf32>, vector<32x32xf32>, vector<32x32xf32> -> vector<32x32xf32>
    %260 = arith.index_cast %c2_i32_148 : i32 to index
    %c0_152 = arith.constant 0 : index
    %c0_153 = arith.constant 0 : index
    %261 = vector.load %arg5[%260, %c0_152, %c0_153] : memref<9x32x32xf32, #tpu.memory_space<vmem>>, vector<1x32x32xf32>
    %262 = vector.shape_cast %261 : vector<1x32x32xf32> to vector<32x32xf32>
    %cst_154 = arith.constant dense<0.000000e+00> : vector<32x32xf32>
    %263 = tpu.matmul %262, %259, %cst_154 {dimension_numbers = #tpu.dot_dimension_numbers<[1], [0], [0], [1], [0, 0, 1, 1], [], []>} : vector<32x32xf32>, vector<32x32xf32>, vector<32x32xf32> -> vector<32x32xf32>
    %264 = arith.addf %255, %263 : vector<32x32xf32>
    %c3_i32_155 = arith.constant 3 : i32
    %265 = arith.index_cast %c3_i32_155 : i32 to index
    %c0_156 = arith.constant 0 : index
    %c0_157 = arith.constant 0 : index
    %266 = vector.load %arg6[%265, %c0_156, %c0_157] : memref<9x32x32xf32, #tpu.memory_space<vmem>>, vector<1x32x32xf32>
    %267 = vector.shape_cast %266 : vector<1x32x32xf32> to vector<32x32xf32>
    %cst_158 = arith.constant dense<0.000000e+00> : vector<32x32xf32>
    %268 = tpu.matmul %236, %267, %cst_158 {dimension_numbers = #tpu.dot_dimension_numbers<[1], [0], [0], [1], [0, 0, 1, 1], [], []>} : vector<32x32xf32>, vector<32x32xf32>, vector<32x32xf32> -> vector<32x32xf32>
    %269 = arith.index_cast %c3_i32_155 : i32 to index
    %c0_159 = arith.constant 0 : index
    %c0_160 = arith.constant 0 : index
    %270 = vector.load %arg5[%269, %c0_159, %c0_160] : memref<9x32x32xf32, #tpu.memory_space<vmem>>, vector<1x32x32xf32>
    %271 = vector.shape_cast %270 : vector<1x32x32xf32> to vector<32x32xf32>
    %cst_161 = arith.constant dense<0.000000e+00> : vector<32x32xf32>
    %272 = tpu.matmul %271, %268, %cst_161 {dimension_numbers = #tpu.dot_dimension_numbers<[1], [0], [0], [1], [0, 0, 1, 1], [], []>} : vector<32x32xf32>, vector<32x32xf32>, vector<32x32xf32> -> vector<32x32xf32>
    %273 = arith.addf %264, %272 : vector<32x32xf32>
    %c4_i32_162 = arith.constant 4 : i32
    %274 = arith.index_cast %c4_i32_162 : i32 to index
    %c0_163 = arith.constant 0 : index
    %c0_164 = arith.constant 0 : index
    %275 = vector.load %arg6[%274, %c0_163, %c0_164] : memref<9x32x32xf32, #tpu.memory_space<vmem>>, vector<1x32x32xf32>
    %276 = vector.shape_cast %275 : vector<1x32x32xf32> to vector<32x32xf32>
    %cst_165 = arith.constant dense<0.000000e+00> : vector<32x32xf32>
    %277 = tpu.matmul %236, %276, %cst_165 {dimension_numbers = #tpu.dot_dimension_numbers<[1], [0], [0], [1], [0, 0, 1, 1], [], []>} : vector<32x32xf32>, vector<32x32xf32>, vector<32x32xf32> -> vector<32x32xf32>
    %278 = arith.index_cast %c4_i32_162 : i32 to index
    %c0_166 = arith.constant 0 : index
    %c0_167 = arith.constant 0 : index
    %279 = vector.load %arg5[%278, %c0_166, %c0_167] : memref<9x32x32xf32, #tpu.memory_space<vmem>>, vector<1x32x32xf32>
    %280 = vector.shape_cast %279 : vector<1x32x32xf32> to vector<32x32xf32>
    %cst_168 = arith.constant dense<0.000000e+00> : vector<32x32xf32>
    %281 = tpu.matmul %280, %277, %cst_168 {dimension_numbers = #tpu.dot_dimension_numbers<[1], [0], [0], [1], [0, 0, 1, 1], [], []>} : vector<32x32xf32>, vector<32x32xf32>, vector<32x32xf32> -> vector<32x32xf32>
    %282 = arith.addf %273, %281 : vector<32x32xf32>
    %c5_i32_169 = arith.constant 5 : i32
    %283 = arith.index_cast %c5_i32_169 : i32 to index
    %c0_170 = arith.constant 0 : index
    %c0_171 = arith.constant 0 : index
    %284 = vector.load %arg6[%283, %c0_170, %c0_171] : memref<9x32x32xf32, #tpu.memory_space<vmem>>, vector<1x32x32xf32>
    %285 = vector.shape_cast %284 : vector<1x32x32xf32> to vector<32x32xf32>
    %cst_172 = arith.constant dense<0.000000e+00> : vector<32x32xf32>
    %286 = tpu.matmul %236, %285, %cst_172 {dimension_numbers = #tpu.dot_dimension_numbers<[1], [0], [0], [1], [0, 0, 1, 1], [], []>} : vector<32x32xf32>, vector<32x32xf32>, vector<32x32xf32> -> vector<32x32xf32>
    %287 = arith.index_cast %c5_i32_169 : i32 to index
    %c0_173 = arith.constant 0 : index
    %c0_174 = arith.constant 0 : index
    %288 = vector.load %arg5[%287, %c0_173, %c0_174] : memref<9x32x32xf32, #tpu.memory_space<vmem>>, vector<1x32x32xf32>
    %289 = vector.shape_cast %288 : vector<1x32x32xf32> to vector<32x32xf32>
    %cst_175 = arith.constant dense<0.000000e+00> : vector<32x32xf32>
    %290 = tpu.matmul %289, %286, %cst_175 {dimension_numbers = #tpu.dot_dimension_numbers<[1], [0], [0], [1], [0, 0, 1, 1], [], []>} : vector<32x32xf32>, vector<32x32xf32>, vector<32x32xf32> -> vector<32x32xf32>
    %291 = arith.addf %282, %290 : vector<32x32xf32>
    %c6_i32_176 = arith.constant 6 : i32
    %292 = arith.index_cast %c6_i32_176 : i32 to index
    %c0_177 = arith.constant 0 : index
    %c0_178 = arith.constant 0 : index
    %293 = vector.load %arg6[%292, %c0_177, %c0_178] : memref<9x32x32xf32, #tpu.memory_space<vmem>>, vector<1x32x32xf32>
    %294 = vector.shape_cast %293 : vector<1x32x32xf32> to vector<32x32xf32>
    %cst_179 = arith.constant dense<0.000000e+00> : vector<32x32xf32>
    %295 = tpu.matmul %236, %294, %cst_179 {dimension_numbers = #tpu.dot_dimension_numbers<[1], [0], [0], [1], [0, 0, 1, 1], [], []>} : vector<32x32xf32>, vector<32x32xf32>, vector<32x32xf32> -> vector<32x32xf32>
    %296 = arith.index_cast %c6_i32_176 : i32 to index
    %c0_180 = arith.constant 0 : index
    %c0_181 = arith.constant 0 : index
    %297 = vector.load %arg5[%296, %c0_180, %c0_181] : memref<9x32x32xf32, #tpu.memory_space<vmem>>, vector<1x32x32xf32>
    %298 = vector.shape_cast %297 : vector<1x32x32xf32> to vector<32x32xf32>
    %cst_182 = arith.constant dense<0.000000e+00> : vector<32x32xf32>
    %299 = tpu.matmul %298, %295, %cst_182 {dimension_numbers = #tpu.dot_dimension_numbers<[1], [0], [0], [1], [0, 0, 1, 1], [], []>} : vector<32x32xf32>, vector<32x32xf32>, vector<32x32xf32> -> vector<32x32xf32>
    %300 = arith.addf %291, %299 : vector<32x32xf32>
    %c7_i32_183 = arith.constant 7 : i32
    %301 = arith.index_cast %c7_i32_183 : i32 to index
    %c0_184 = arith.constant 0 : index
    %c0_185 = arith.constant 0 : index
    %302 = vector.load %arg6[%301, %c0_184, %c0_185] : memref<9x32x32xf32, #tpu.memory_space<vmem>>, vector<1x32x32xf32>
    %303 = vector.shape_cast %302 : vector<1x32x32xf32> to vector<32x32xf32>
    %cst_186 = arith.constant dense<0.000000e+00> : vector<32x32xf32>
    %304 = tpu.matmul %236, %303, %cst_186 {dimension_numbers = #tpu.dot_dimension_numbers<[1], [0], [0], [1], [0, 0, 1, 1], [], []>} : vector<32x32xf32>, vector<32x32xf32>, vector<32x32xf32> -> vector<32x32xf32>
    %305 = arith.index_cast %c7_i32_183 : i32 to index
    %c0_187 = arith.constant 0 : index
    %c0_188 = arith.constant 0 : index
    %306 = vector.load %arg5[%305, %c0_187, %c0_188] : memref<9x32x32xf32, #tpu.memory_space<vmem>>, vector<1x32x32xf32>
    %307 = vector.shape_cast %306 : vector<1x32x32xf32> to vector<32x32xf32>
    %cst_189 = arith.constant dense<0.000000e+00> : vector<32x32xf32>
    %308 = tpu.matmul %307, %304, %cst_189 {dimension_numbers = #tpu.dot_dimension_numbers<[1], [0], [0], [1], [0, 0, 1, 1], [], []>} : vector<32x32xf32>, vector<32x32xf32>, vector<32x32xf32> -> vector<32x32xf32>
    %309 = arith.addf %300, %308 : vector<32x32xf32>
    %c8_i32_190 = arith.constant 8 : i32
    %310 = arith.index_cast %c8_i32_190 : i32 to index
    %c0_191 = arith.constant 0 : index
    %c0_192 = arith.constant 0 : index
    %311 = vector.load %arg6[%310, %c0_191, %c0_192] : memref<9x32x32xf32, #tpu.memory_space<vmem>>, vector<1x32x32xf32>
    %312 = vector.shape_cast %311 : vector<1x32x32xf32> to vector<32x32xf32>
    %cst_193 = arith.constant dense<0.000000e+00> : vector<32x32xf32>
    %313 = tpu.matmul %236, %312, %cst_193 {dimension_numbers = #tpu.dot_dimension_numbers<[1], [0], [0], [1], [0, 0, 1, 1], [], []>} : vector<32x32xf32>, vector<32x32xf32>, vector<32x32xf32> -> vector<32x32xf32>
    %314 = arith.index_cast %c8_i32_190 : i32 to index
    %c0_194 = arith.constant 0 : index
    %c0_195 = arith.constant 0 : index
    %315 = vector.load %arg5[%314, %c0_194, %c0_195] : memref<9x32x32xf32, #tpu.memory_space<vmem>>, vector<1x32x32xf32>
    %316 = vector.shape_cast %315 : vector<1x32x32xf32> to vector<32x32xf32>
    %cst_196 = arith.constant dense<0.000000e+00> : vector<32x32xf32>
    %317 = tpu.matmul %316, %313, %cst_196 {dimension_numbers = #tpu.dot_dimension_numbers<[1], [0], [0], [1], [0, 0, 1, 1], [], []>} : vector<32x32xf32>, vector<32x32xf32>, vector<32x32xf32> -> vector<32x32xf32>
    %318 = arith.addf %309, %317 : vector<32x32xf32>
    %c9_i32_197 = arith.constant 9 : i32
    %319 = vector.broadcast %1 : vector<1x32xf32> to vector<32x32xf32>
    %320 = arith.addf %318, %319 : vector<32x32xf32>
    %cst_198 = arith.constant 0.000000e+00 : f32
    %321 = vector.broadcast %cst_198 : f32 to vector<32x32xf32>
    %322 = arith.maximumf %320, %321 : vector<32x32xf32>
    %323 = vector.shape_cast %322 : vector<32x32xf32> to vector<4x8x32xf32>
    %cst_199 = arith.constant dense<0xFF800000> : vector<4x32xf32>
    %324 = vector.multi_reduction <maximumf>, %323, %cst_199 [1] : vector<4x8x32xf32> to vector<4x32xf32>
    %c0_200 = arith.constant 0 : index
    %c0_201 = arith.constant 0 : index
    %325 = vector.load %arg8[%c0_200, %c0_201] : memref<32x32xf32, #tpu.memory_space<vmem>>, vector<32x32xf32>
    %cst_202 = arith.constant dense<0.000000e+00> : vector<4x32xf32>
    %326 = tpu.matmul %324, %325, %cst_202 {dimension_numbers = #tpu.dot_dimension_numbers<[1], [0], [0], [1], [0, 0, 1, 1], [], []>} : vector<4x32xf32>, vector<32x32xf32>, vector<4x32xf32> -> vector<4x32xf32>
    %c0_203 = arith.constant 0 : index
    %c0_204 = arith.constant 0 : index
    %327 = vector.load %arg9[%c0_203, %c0_204] : memref<1x32xf32, #tpu.memory_space<vmem>>, vector<1x32xf32>
    %328 = vector.broadcast %327 : vector<1x32xf32> to vector<4x32xf32>
    %329 = arith.addf %326, %328 : vector<4x32xf32>
    %cst_205 = arith.constant 0.000000e+00 : f32
    %330 = vector.broadcast %cst_205 : f32 to vector<4x32xf32>
    %331 = arith.maximumf %329, %330 : vector<4x32xf32>
    %c0_206 = arith.constant 0 : index
    %c0_207 = arith.constant 0 : index
    %332 = vector.load %arg10[%c0_206, %c0_207] : memref<32x1xf32, #tpu.memory_space<vmem>>, vector<32x1xf32>
    %cst_208 = arith.constant dense<0.000000e+00> : vector<4x1xf32>
    %333 = tpu.matmul %331, %332, %cst_208 {dimension_numbers = #tpu.dot_dimension_numbers<[1], [0], [0], [1], [0, 0, 1, 1], [], []>} : vector<4x32xf32>, vector<32x1xf32>, vector<4x1xf32> -> vector<4x1xf32>
    %c0_209 = arith.constant 0 : index
    %c0_210 = arith.constant 0 : index
    %334 = vector.load %arg11[%c0_209, %c0_210] : memref<1x1xf32, #tpu.memory_space<vmem>>, vector<1x1xf32>
    %335 = vector.broadcast %334 : vector<1x1xf32> to vector<4x1xf32>
    %336 = arith.addf %333, %335 : vector<4x1xf32>
    %c0_211 = arith.constant 0 : index
    %c0_212 = arith.constant 0 : index
    %337 = vector.load %arg12[%c0_211, %c0_212] : memref<4x1xf32, #tpu.memory_space<vmem>>, vector<4x1xf32>
    tpu.vector_store %arg12[%c0_211, %c0_212], %336 {strides = array<i32>} : memref<4x1xf32, #tpu.memory_space<vmem>>, vector<4x1xf32>,
    return
  }
}

</mosaic_0001>

<bundles_post_ra>
// kernel: gcn_single_forward.1
= control target key start
LH: loop header
LB: loop body
LE: loop exit
PB: predicated region body
PF: predicated region fallthrough
CT: control target
= control target key end

     0   :  { %s7018_s0 = inlined_call_operand.vmem [shape: f32[32,1], index: 0, kind: input, shape index: {}]   ;;  %s7019_s1 = inlined_call_operand.vmem [shape: f32[1,32], index: 1, kind: input, shape index: {}]   ;;  %s7020_s2 = inlined_call_operand.vmem [shape: f32[1,32], index: 2, kind: input, shape index: {}]   ;;  %s7021_s3 = inlined_call_operand.vmem [shape: f32[9,1,32], index: 3, kind: input, shape index: {}]   ;;  %s7022_s4 = inlined_call_operand.vmem [shape: f32[9,1,32], index: 4, kind: input, shape index: {}]   ;;  %s7023_s5 = inlined_call_operand.hbm [shape: f32[9,32,32], index: 5, kind: input, shape index: {}]   ;;  %s7024_s6 = inlined_call_operand.vmem [shape: f32[9,32,32], index: 6, kind: input, shape index: {}]   ;;  %s7025_s7 = inlined_call_operand.vmem [shape: f32[1,32], index: 7, kind: input, shape index: {}]   ;;  %s7026_s8 = inlined_call_operand.vmem [shape: f32[32,32], index: 8, kind: input, shape index: {}]   ;;  %s7027_s9 = inlined_call_operand.vmem [shape: f32[1,32], index: 9, kind: input, shape index: {}]   ;;  %s7028_s10 = inlined_call_operand.vmem [shape: f32[32,1], index: 10, kind: input, shape index: {}]   ;;  %s7029_s11 = inlined_call_operand.<no memory space> [shape: f32[1,1], index: 11, kind: input, shape index: {}]   ;;  %s7030_s12 = inlined_call_operand.vmem [shape: f32[4,1], index: 12, kind: output, shape index: {}]  }
   0x1   :  { %v17_v0 = vstv %s7029_s11 }
   0x2   :  { %18 = vst [vmem:[#allocation2] sm:$0x1] %v17_v0 }
   0x3   :  { %19 = vsyncpa [#allocation4], 0  ;;  %s6009_s21 = smov [#allocation3]  }
   0x4   :  { %s35_s22 = sshll.u32 %s6009_s21, 4  ;;  %s36_s22 = int_to_ptr.vmem [resolvable:$true] %s35_s22 }
   0x5   :  { %s5995_s23 = scalar_lea.vmem %s36_s22, 4608  ;;  %p6000_p1 = scmp.lt.s32.totalorder %s36_s22, %s36_s22 }
   0x6   :  { %p5996_p0 = scmp.ne.s32.totalorder %s36_s22, %s5995_s23  ;;  %p6001_p2 = scmp.lt.s32.totalorder %s5995_s23, %s5995_s23 }
   0x8   :  { %p6002_p3 = por %p6001_p2, %p6000_p1 }
   0xa   :  { %p6003_p4 = pnand %p6002_p3, %p5996_p0 }
   0xc   :  { %6006 = shalt.err (!%p6003_p4)
}
   0xd   :  { %s6010_s24 = smov 128   ;;  %s6011_s25 = smov 8  }
   0xe   :  { %41 = dma.hbm_to_vmem [thread:$0]  %s7023_s5, 4608, %s36_s22, [#allocation4], %s6010_s24, %s6010_s24, %s6011_s25  }
   0xf   :  { %6007 = dma.done.wait [#allocation4], 4608  }
  0x10   :  { %6008 = vsyncadd [#allocation4], 4294962688  ;;  %v6012_v1 = vmov 0   ;;  %v60_v2 = vld [vmem:[%s7018_s0 + $0x18] sm:$0xff]  ;;  %v58_v3 = vld [vmem:[%s7018_s0 + $0x8] sm:$0xff]  ;;  %vm137_vm0 = vcmask 261120  }
  0x11   :  { %5949 = vset.pattern.permute.xlu1 %v6012_v1  ;;  %5948 = vset.pattern.permute.xlu0 %v6012_v1  ;;  %v59_v4 = vld [vmem:[%s7018_s0 + $0x10] sm:$0xff]  ;;  %v57_v5 = vld [vmem:[%s7018_s0] sm:$0xff]  ;;  %vm6014_vm1 = vmmov 0   ;;  %vm4499_vm2 = vcmask 1041409   ;;  %vm4501_vm3 = vcmask 1042434   ;;  %vm4503_vm4 = vcmask 1043459  }
  0x12   :  { %80 = vperm.xlu0 %5948, %v60_v2   ;;  %70 = vperm.xlu1 %5949, %v58_v3   ;;  %v6098_v6 = vld [vmem:[#allocation3 + $0x20] sm:$0xff]  ;;  %v4669_v9 = vld [vmem:[%s7021_s3] ss:$0 sm:$0xff]  ;;  %v6148_v38 = vld [vmem:[#allocation3 + $0x28] sm:$0xff]  ;;  %vm4662_vm5 = vcmask 3072  }
  0x13   :  { %v6100_v7 = vld [vmem:[#allocation3] sm:$0xff]  ;;  %5298 = vmatprep.mubr.msk.f32.mxu0 %vm137_vm0, %v6098_v6  ;;  %v4670_v13 = vld [vmem:[%s7022_s4] ss:$0 sm:$0xff]  ;;  %v6150_v39 = vld [vmem:[#allocation3 + $0x8] sm:$0xff] }
  0x14   :  { %5312 = vmatprep.mubr.msk.f32.mxu1 %vm137_vm0, %v6100_v7  ;;  %v4672_v8 = vld [vmem:[%s7021_s3 + $0x1] ss:$0 sm:$0xff]  ;;  %v4684_v28 = vld [vmem:[%s7021_s3 + $0x2] ss:$0 sm:$0xff]  ;;  %v4692_v29 = vld [vmem:[%s7021_s3 + $0x3] ss:$0 sm:$0xff] }
  0x15   :  { %v4674_v12 = vld [vmem:[%s7022_s4 + $0x1] ss:$0 sm:$0xff]  ;;  %v4686_v36 = vld [vmem:[%s7022_s4 + $0x2] ss:$0 sm:$0xff]  ;;  %v4694_v37 = vld [vmem:[%s7022_s4 + $0x3] ss:$0 sm:$0xff] }
  0x16   :  { %75 = vperm.xlu0 %5948, %v59_v4   ;;  %65 = vperm.xlu1 %5949, %v57_v5   ;;  %v6159_v47 = vld [vmem:[#allocation3 + $0x30] sm:$0xff]  ;;  %v6164_v50 = vld [vmem:[#allocation3 + $0x38] sm:$0xff]  ;;  %v4700_v54 = vld [vmem:[%s7021_s3 + $0x4] ss:$0 sm:$0xff] }
  0x17   :  { %v6161_v48 = vld [vmem:[#allocation3 + $0x10] sm:$0xff]  ;;  %v6166_v51 = vld [vmem:[#allocation3 + $0x18] sm:$0xff]  ;;  %v4708_v55 = vld [vmem:[%s7021_s3 + $0x5] ss:$0 sm:$0xff] }
  0x18   :  { %v6185_v61 = vld [vmem:[#allocation3 + $0x40] sm:$0xff]  ;;  %v6191_v0 = vld [vmem:[#allocation3 + $0x48] sm:$0xff] }
  0x19   :  { %v4702_v62 = vld [vmem:[%s7022_s4 + $0x4] ss:$0 sm:$0xff]  ;;  %v4710_v1 = vld [vmem:[%s7022_s4 + $0x5] ss:$0 sm:$0xff] }
  0x1a   :  { %v6196_v2 = vld [vmem:[#allocation3 + $0x60] sm:$0xff] }
  0x8d   :  { %v6112_v10 = vpop.permute.xlu0 %80  ;;  %v6114_v11 = vpop.permute.xlu1 %70 }
  0x8e   :  { %v119_v14 = vmul.f32 %v4672_v8, %v6112_v10  ;;  %v92_v15 = vmul.f32 %v4669_v9, %v6112_v10  ;;  %v117_v20 = vmul.f32 %v4672_v8, %v6114_v11  ;;  %v90_v23 = vmul.f32 %v4669_v9, %v6114_v11 }
  0x8f   :  { %v343_v32 = vmul.f32 %v4684_v28, %v6112_v10  ;;  %v473_v33 = vmul.f32 %v4692_v29, %v6112_v10  ;;  %v341_v44 = vmul.f32 %v4684_v28, %v6114_v11  ;;  %v471_v49 = vmul.f32 %v4692_v29, %v6114_v11 }
  0x90   :  { %v131_v16 = vadd.f32 %v4674_v12, %v119_v14  ;;  %v103_v17 = vadd.f32 %v4670_v13, %v92_v15  ;;  %v129_v30 = vadd.f32 %v4674_v12, %v117_v20  ;;  %v101_v31 = vadd.f32 %v4670_v13, %v90_v23  ;;  %v6211_v15 = vld [vmem:[#allocation3 + $0x50] sm:$0xff]  ;;  %v4716_v23 = vld [vmem:[%s7021_s3 + $0x6] ss:$0 sm:$0xff] }
  0x91   :  { %v6124_v18 = vpop.permute.xlu0 %75  ;;  %v6126_v19 = vpop.permute.xlu1 %65  ;;  %v355_v42 = vadd.f32 %v4686_v36, %v343_v32  ;;  %v485_v43 = vadd.f32 %v4694_v37, %v473_v33  ;;  %v353_v56 = vadd.f32 %v4686_v36, %v341_v44  ;;  %v483_v57 = vadd.f32 %v4694_v37, %v471_v49  ;;  %v6216_v20 = vld [vmem:[#allocation3 + $0x70] sm:$0xff]  ;;  %v4718_v32 = vld [vmem:[%s7022_s4 + $0x6] ss:$0 sm:$0xff] }
  0x92   :  { %5290 = vmatprep.subr.mxu0 %v131_v16  ;;  %5304 = vmatprep.subr.mxu1 %v103_v17  ;;  %v118_v21 = vmul.f32 %v4672_v8, %v6124_v18  ;;  %v91_v22 = vmul.f32 %v4669_v9, %v6124_v18  ;;  %v116_v26 = vmul.f32 %v4672_v8, %v6126_v19  ;;  %v6202_v8 = vld [vmem:[#allocation3 + $0x68] sm:$0xff] }
  0x93   :  { %5291 = vmatpush3.msra.mxu0 %v131_v16  ;;  %5305 = vmatpush3.msra.mxu1 %v103_v17  ;;  %v89_v27 = vmul.f32 %v4669_v9, %v6126_v19  ;;  %v342_v40 = vmul.f32 %v4684_v28, %v6124_v18  ;;  %v472_v41 = vmul.f32 %v4692_v29, %v6124_v18  ;;  %v6214_v17 = vld [vmem:[#allocation3 + $0x58] sm:$0xff] }
  0x94   :  { %v130_v24 = vadd.f32 %v4674_v12, %v118_v21  ;;  %v102_v25 = vadd.f32 %v4670_v13, %v91_v22  ;;  %v128_v34 = vadd.f32 %v4674_v12, %v116_v26  ;;  %v340_v52 = vmul.f32 %v4684_v28, %v6126_v19  ;;  %v4724_v26 = vld [vmem:[%s7021_s3 + $0x7] ss:$0 sm:$0xff] }
  0x95   :  { %v100_v35 = vadd.f32 %v4670_v13, %v89_v27  ;;  %v354_v45 = vadd.f32 %v4686_v36, %v342_v40  ;;  %v484_v46 = vadd.f32 %v4694_v37, %v472_v41  ;;  %v470_v53 = vmul.f32 %v4692_v29, %v6126_v19 }
  0x96   :  { %5292 = vmatprep.subr.mxu0 %v130_v24  ;;  %5306 = vmatprep.subr.mxu1 %v102_v25  ;;  %v603_v58 = vmul.f32 %v4700_v54, %v6112_v10  ;;  %v352_v59 = vadd.f32 %v4686_v36, %v340_v52  ;;  %v733_v63 = vmul.f32 %v4708_v55, %v6112_v10  ;;  %v6248_v36 = vld [vmem:[#allocation3 + $0xa0] sm:$0xff]  ;;  %v6264_v52 = vld [vmem:[#allocation3 + $0x90] sm:$0xff] }
  0x97   :  { %5293 = vmatpush3.msra.mxu0 %v130_v24  ;;  %5307 = vmatpush3.msra.mxu1 %v102_v25  ;;  %v482_v60 = vadd.f32 %v4694_v37, %v470_v53  ;;  %v602_v3 = vmul.f32 %v4700_v54, %v6124_v18  ;;  %v732_v4 = vmul.f32 %v4708_v55, %v6124_v18  ;;  %v6225_v25 = vld [vmem:[#allocation3 + $0x78] sm:$0xff] }
  0x98   :  { %5294 = vmatprep.subr.mxu0 %v129_v30  ;;  %5308 = vmatprep.subr.mxu1 %v101_v31  ;;  %v615_v5 = vadd.f32 %v4702_v62, %v603_v58  ;;  %v745_v9 = vadd.f32 %v4710_v1, %v733_v63  ;;  %v601_v12 = vmul.f32 %v4700_v54, %v6114_v11  ;;  %v6266_v53 = vld [vmem:[#allocation3 + $0x98] sm:$0xff] }
  0x99   :  { %5295 = vmatpush3.msra.mxu0 %v129_v30  ;;  %5309 = vmatpush3.msra.mxu1 %v101_v31  ;;  %v614_v13 = vadd.f32 %v4702_v62, %v602_v3  ;;  %v744_v14 = vadd.f32 %v4710_v1, %v732_v4  ;;  %v731_v16 = vmul.f32 %v4708_v55, %v6114_v11  ;;  %v6237_v31 = vld [vmem:[#allocation3 + $0x80] sm:$0xff] }
  0x9a   :  { %5296 = vmatprep.subr.mxu0 %v128_v34  ;;  %5310 = vmatprep.subr.mxu1 %v100_v35  ;;  %v600_v21 = vmul.f32 %v4700_v54, %v6126_v19  ;;  %v730_v22 = vmul.f32 %v4708_v55, %v6126_v19  ;;  %v613_v24 = vadd.f32 %v4702_v62, %v601_v12  ;;  %v6284_v3 = vld [vmem:[#allocation3 + $0xc0] sm:$0xff] }
  0x9b   :  { %5297 = vmatpush3.msra.mxu0 %v128_v34  ;;  %5311 = vmatpush3.msra.mxu1 %v100_v35  ;;  %v743_v27 = vadd.f32 %v4710_v1, %v731_v16  ;;  %v863_v28 = vmul.f32 %v4716_v23, %v6112_v10  ;;  %v993_v33 = vmul.f32 %v4724_v26, %v6112_v10  ;;  %v6243_v34 = vld [vmem:[#allocation3 + $0x88] sm:$0xff]  ;;  %v4726_v35 = vld [vmem:[%s7022_s4 + $0x7] ss:$0 sm:$0xff]  ;;  %v4734_v4 = vld [vmem:[%s7022_s4 + $0x8] ss:$0 sm:$0xff] }
  0x9c   :  { %5299 = vmatmul.mubr.msk.f32.vlgmr.msra.gmra.mxu0 %vm137_vm0, %v6148_v38  ;;  %5313 = vmatmul.mubr.msk.f32.vlgmr.msra.gmra.mxu1 %vm137_vm0, %v6150_v39  ;;  %v612_v29 = vadd.f32 %v4702_v62, %v600_v21  ;;  %v742_v30 = vadd.f32 %v4710_v1, %v730_v22  ;;  %v862_v37 = vmul.f32 %v4716_v23, %v6124_v18  ;;  %v6307_v21 = vld [vmem:[#allocation3 + $0xf0] sm:$0xff] }
  0x9d   :  { %5318 = vmatprep.subr.mxu0 %v355_v42  ;;  %5332 = vmatprep.subr.mxu1 %v485_v43  ;;  %v992_v40 = vmul.f32 %v4724_v26, %v6124_v18  ;;  %v875_v41 = vadd.f32 %v4718_v32, %v863_v28  ;;  %v861_v44 = vmul.f32 %v4716_v23, %v6114_v11  ;;  %v6330_v28 = vld [vmem:[#allocation3 + $0x110] sm:$0xff] }
  0x9e   :  { %5319 = vmatpush3.msra.mxu0 %v355_v42  ;;  %5333 = vmatpush3.msra.mxu1 %v485_v43  ;;  %v6254_v42 = vld [vmem:[#allocation3 + $0xa8] sm:$0xff]  ;;  %v1005_v43 = vadd.f32 %v4726_v35, %v993_v33  ;;  %v860_v54 = vmul.f32 %v4716_v23, %v6126_v19  ;;  %v990_v55 = vmul.f32 %v4724_v26, %v6126_v19 }
  0x9f   :  { %5320 = vmatprep.subr.mxu0 %v354_v45  ;;  %5334 = vmatprep.subr.mxu1 %v484_v46  ;;  %v1004_v49 = vadd.f32 %v4726_v35, %v992_v40  ;;  %7073 = vst [vmem:[#allocation8_spill] sm:$0xff] %v6284_v3  ;;  %7078 = vst [vmem:[#allocation13_spill] sm:$0xff] %v6307_v21  ;;  %v6357_v33 = vld [vmem:[%s7024_s6 + $0x10] sm:$0xff]  ;;  %v6376_v40 = vld [vmem:[%s7024_s6 + $0x28] sm:$0xff] }
  0xa0   :  { %5301 = vmatprep.mubr.msk.f32.mxu0 %vm137_vm0, %v6159_v47  ;;  %5315 = vmatprep.mubr.msk.f32.mxu1 %vm137_vm0, %v6161_v48  ;;  %v872_v62 = vadd.f32 %v4718_v32, %v860_v54  ;;  %v1002_v1 = vadd.f32 %v4726_v35, %v990_v55  ;;  %7083 = vst [vmem:[#allocation18_spill] sm:$0xff] %v6330_v28  ;;  %7087 = vst [vmem:[#allocation22_spill] sm:$0xff] %v6376_v40 }
  0xa1   :  { %5321 = vmatpush3.msra.mxu0 %v354_v45  ;;  %5335 = vmatpush3.msra.mxu1 %v484_v46  ;;  %v991_v45 = vmul.f32 %v4724_v26, %v6114_v11  ;;  %v874_v46 = vadd.f32 %v4718_v32, %v862_v37  ;;  %v6320_v26 = vld [vmem:[#allocation3 + $0x100] sm:$0xff] }
  0xa2   :  { %5302 = vmatmul.mubr.msk.f32.gmra.mxu0 %vm137_vm0, %v6164_v50  ;;  %5316 = vmatmul.mubr.msk.f32.gmra.mxu1 %vm137_vm0, %v6166_v51  ;;  %7081 = vst [vmem:[#allocation16_spill] sm:$0xff] %v6320_v26  ;;  %v6371_v37 = vld [vmem:[%s7024_s6 + $0x8] sm:$0xff] }
  0xa3   :  { %5322 = vmatprep.subr.mxu0 %v353_v56  ;;  %5336 = vmatprep.subr.mxu1 %v483_v57  ;;  %v1003_v58 = vadd.f32 %v4726_v35, %v991_v45  ;;  %v6362_v35 = vld [vmem:[%s7024_s6 + $0x30] sm:$0xff] }
  0xa4   :  { %5323 = vmatpush3.msra.mxu0 %v353_v56  ;;  %5337 = vmatpush3.msra.mxu1 %v483_v57  ;;  %v4732_v56 = vld [vmem:[%s7021_s3 + $0x8] ss:$0 sm:$0xff]  ;;  %v873_v57 = vadd.f32 %v4718_v32, %v861_v44  ;;  %v6348_v32 = vld [vmem:[%s7024_s6 + $0x38] sm:$0xff]  ;;  %7086 = vst [vmem:[#allocation21_spill] sm:$0xff] %v6362_v35 }
  0xa5   :  { %5324 = vmatprep.subr.mxu0 %v352_v59  ;;  %5338 = vmatprep.subr.mxu1 %v482_v60  ;;  %v1123_v63 = vmul.f32 %v4732_v56, %v6112_v10  ;;  %v6294_v10 = vld [vmem:[#allocation3 + $0xe0] sm:$0xff]  ;;  %v1120_v22 = vmul.f32 %v4732_v56, %v6126_v19  ;;  %7085 = vst [vmem:[#allocation20_spill] sm:$0xff] %v6348_v32 }
  0xa6   :  { %5325 = vmatpush3.msra.mxu0 %v352_v59  ;;  %5326 = vmatprep.mubr.msk.f32.mxu0 %vm137_vm0, %v6185_v61  ;;  %v6275_v59 = vld [vmem:[#allocation3 + $0xb0] sm:$0xff]  ;;  %7075 = vst [vmem:[#allocation10_spill] sm:$0xff] %v6294_v10 }
  0xa7   :  { %5339 = vmatpush3.msra.mxu1 %v482_v60  ;;  %5327 = vmatmul.mubr.msk.f32.vlgmr.msra.gmra.mxu0 %vm137_vm0, %v6191_v0  ;;  %7071 = vst [vmem:[#allocation6_spill] sm:$0xff] %v6275_v59  ;;  %v6279_v60 = vld [vmem:[#allocation3 + $0xb8] sm:$0xff]  ;;  %v1135_v12 = vadd.f32 %v4734_v4, %v1123_v63  ;;  %v1132_v19 = vadd.f32 %v4734_v4, %v1120_v22 }
  0xa8   :  { %5340 = vmatprep.mubr.msk.f32.mxu1 %vm137_vm0, %v6196_v2  ;;  %5346 = vmatprep.subr.mxu0 %v615_v5  ;;  %7072 = vst [vmem:[#allocation7_spill] sm:$0xff] %v6279_v60 }
  0xa9   :  { %5360 = vmatprep.subr.mxu1 %v745_v9  ;;  %5341 = vmatmul.mubr.msk.f32.vlgmr.msra.gmra.mxu1 %vm137_vm0, %v6202_v8 }
  0xaa   :  { %5347 = vmatpush3.msra.mxu0 %v615_v5  ;;  %5361 = vmatpush3.msra.mxu1 %v745_v9  ;;  %v6289_v5 = vld [vmem:[#allocation3 + $0xc8] sm:$0xff]  ;;  %v1122_v9 = vmul.f32 %v4732_v56, %v6124_v18  ;;  %v6303_v18 = vld [vmem:[#allocation3 + $0xd0] sm:$0xff] }
  0xab   :  { %5348 = vmatprep.subr.mxu0 %v614_v13  ;;  %5362 = vmatprep.subr.mxu1 %v744_v14  ;;  %7074 = vst [vmem:[#allocation9_spill] sm:$0xff] %v6289_v5  ;;  %7077 = vst [vmem:[#allocation12_spill] sm:$0xff] %v6303_v18 }
  0xac   :  { %5329 = vmatprep.mubr.msk.f32.mxu0 %vm137_vm0, %v6211_v15  ;;  %5349 = vmatpush3.msra.mxu0 %v614_v13  ;;  %v6298_v13 = vld [vmem:[#allocation3 + $0xe8] sm:$0xff]  ;;  %v1134_v16 = vadd.f32 %v4734_v4, %v1122_v9 }
  0xad   :  { %5363 = vmatpush3.msra.mxu1 %v744_v14  ;;  %5330 = vmatmul.mubr.msk.f32.gmra.mxu0 %vm137_vm0, %v6214_v17  ;;  %7076 = vst [vmem:[#allocation11_spill] sm:$0xff] %v6298_v13  ;;  %v1121_v14 = vmul.f32 %v4732_v56, %v6114_v11  ;;  %v6312_v11 = vld [vmem:[#allocation3 + $0xd8] sm:$0xff] }
  0xae   :  { %5343 = vmatprep.mubr.msk.f32.mxu1 %vm137_vm0, %v6216_v20  ;;  %5350 = vmatprep.subr.mxu0 %v613_v24  ;;  %7079 = vst [vmem:[#allocation14_spill] sm:$0xff] %v6312_v11 }
  0xaf   :  { %5364 = vmatprep.subr.mxu1 %v743_v27  ;;  %5344 = vmatmul.mubr.msk.f32.gmra.mxu1 %vm137_vm0, %v6225_v25  ;;  %v1133_v23 = vadd.f32 %v4734_v4, %v1121_v14 }
  0xb0   :  { %5351 = vmatpush3.msra.mxu0 %v613_v24  ;;  %5365 = vmatpush3.msra.mxu1 %v743_v27  ;;  %v6316_v24 = vld [vmem:[#allocation3 + $0xf8] sm:$0xff]  ;;  %v6326_v27 = vld [vmem:[#allocation3 + $0x108] sm:$0xff] }
  0xb1   :  { %5352 = vmatprep.subr.mxu0 %v612_v29  ;;  %5366 = vmatprep.subr.mxu1 %v742_v30  ;;  %7080 = vst [vmem:[#allocation15_spill] sm:$0xff] %v6316_v24  ;;  %7082 = vst [vmem:[#allocation17_spill] sm:$0xff] %v6326_v27 }
  0xb2   :  { %5353 = vmatpush3.msra.mxu0 %v612_v29  ;;  %5354 = vmatprep.mubr.msk.f32.mxu0 %vm137_vm0, %v6237_v31  ;;  %v6336_v29 = vld [vmem:[#allocation3 + $0x118] sm:$0xff] }
  0xb3   :  { %5367 = vmatpush3.msra.mxu1 %v742_v30  ;;  %5355 = vmatmul.mubr.msk.f32.vlgmr.msra.gmra.mxu0 %vm137_vm0, %v6243_v34  ;;  %7084 = vst [vmem:[#allocation19_spill] sm:$0xff] %v6336_v29  ;;  %v6343_v30 = vld [vmem:[%s7024_s6 + $0x18] sm:$0xff] }
  0xb4   :  { %5368 = vmatprep.mubr.msk.f32.mxu1 %vm137_vm0, %v6248_v36  ;;  %5374 = vmatprep.subr.mxu0 %v875_v41 }
  0xb5   :  { %5388 = vmatprep.subr.mxu1 %v1005_v43  ;;  %5369 = vmatmul.mubr.msk.f32.vlgmr.msra.gmra.mxu1 %vm137_vm0, %v6254_v42 }
  0xb6   :  { %5375 = vmatpush3.msra.mxu0 %v875_v41  ;;  %5389 = vmatpush3.msra.mxu1 %v1005_v43  ;;  %v6381_v41 = vld [vmem:[%s7024_s6] sm:$0xff] }
  0xb7   :  { %5376 = vmatprep.subr.mxu0 %v874_v46  ;;  %5390 = vmatprep.subr.mxu1 %v1004_v49  ;;  %v6388_v43 = vld [vmem:[%s7024_s6 + $0x20] sm:$0xff] }
  0xb8   :  { %5357 = vmatprep.mubr.msk.f32.mxu0 %vm137_vm0, %v6264_v52  ;;  %5377 = vmatpush3.msra.mxu0 %v874_v46  ;;  %7088 = vst [vmem:[#allocation23_spill] sm:$0xff] %v6388_v43 }
  0xb9   :  { %5391 = vmatpush3.msra.mxu1 %v1004_v49  ;;  %5358 = vmatmul.mubr.msk.f32.gmra.mxu0 %vm137_vm0, %v6266_v53 }
  0xba   :  { %5378 = vmatprep.subr.mxu0 %v873_v57  ;;  %5392 = vmatprep.subr.mxu1 %v1003_v58 }
  0xbb   :  { %5371 = vmatprep.mubr.msk.f32.mxu1 %vm137_vm0, %v6275_v59  ;;  %5379 = vmatpush3.msra.mxu0 %v873_v57 }
  0xbc   :  { %5393 = vmatpush3.msra.mxu1 %v1003_v58  ;;  %5380 = vmatprep.subr.mxu0 %v872_v62 }
  0xbd   :  { %5372 = vmatmul.mubr.msk.f32.gmra.mxu1 %vm137_vm0, %v6279_v60  ;;  %5394 = vmatprep.subr.mxu1 %v1002_v1 }
  0xbe   :  { %5381 = vmatpush3.msra.mxu0 %v872_v62  ;;  %5382 = vmatprep.mubr.msk.f32.mxu0 %vm137_vm0, %v6284_v3 }
  0xbf   :  { %5395 = vmatpush3.msra.mxu1 %v1002_v1  ;;  %5383 = vmatmul.mubr.msk.f32.vlgmr.msra.gmra.mxu0 %vm137_vm0, %v6289_v5 }
  0xc0   :  { %5402 = vmatprep.subr.mxu0 %v1135_v12  ;;  %5396 = vmatprep.mubr.msk.f32.mxu1 %vm137_vm0, %v6294_v10 }
  0xc1   :  { %5403 = vmatpush3.msra.mxu0 %v1135_v12  ;;  %5397 = vmatmul.mubr.msk.f32.vlgmr.msra.gmra.mxu1 %vm137_vm0, %v6298_v13 }
  0xc2   :  { %5404 = vmatprep.subr.mxu0 %v1134_v16  ;;  %5385 = vmatprep.mubr.msk.f32.mxu0 %vm137_vm0, %v6303_v18 }
  0xc3   :  { %5405 = vmatpush3.msra.mxu0 %v1134_v16  ;;  %5399 = vmatprep.mubr.msk.f32.mxu1 %vm137_vm0, %v6307_v21 }
  0xc4   :  { %5386 = vmatmul.mubr.msk.f32.gmra.mxu0 %vm137_vm0, %v6312_v11  ;;  %5406 = vmatprep.subr.mxu0 %v1133_v23 }
  0xc5   :  { %5407 = vmatpush3.msra.mxu0 %v1133_v23  ;;  %5400 = vmatmul.mubr.msk.f32.gmra.mxu1 %vm137_vm0, %v6316_v24 }
  0xc6   :  { %5408 = vmatprep.subr.mxu0 %v1132_v19  ;;  %5410 = vmatprep.mubr.msk.f32.mxu0 %vm137_vm0, %v6320_v26 }
  0xc7   :  { %5409 = vmatpush3.msra.mxu0 %v1132_v19  ;;  %5416 = vmatprep.subr.mxu1 %v6343_v30 }
  0xc8   :  { %5411 = vmatmul.mubr.msk.f32.vlgmr.msra.gmra.mxu0 %vm137_vm0, %v6326_v27  ;;  %5430 = vmatprep.subr.mxu0 %v6348_v32 }
  0xc9   :  { %5413 = vmatprep.mubr.msk.f32.mxu0 %vm137_vm0, %v6330_v28  ;;  %5417 = vmatpush3.msra.mxu1 %v6343_v30 }
  0xca   :  { %5431 = vmatpush3.msra.mxu0 %v6348_v32  ;;  %5418 = vmatprep.subr.mxu1 %v6357_v33 }
  0xcb   :  { %5432 = vmatprep.subr.mxu0 %v6362_v35  ;;  %5419 = vmatpush3.msra.mxu1 %v6357_v33 }
  0xcc   :  { %5414 = vmatmul.mubr.msk.f32.gmra.mxu0 %vm137_vm0, %v6336_v29  ;;  %5420 = vmatprep.subr.mxu1 %v6371_v37 }
  0xcd   :  { %5433 = vmatpush3.msra.mxu0 %v6362_v35  ;;  %5421 = vmatpush3.msra.mxu1 %v6371_v37 }
  0xce   :  { %5434 = vmatprep.subr.mxu0 %v6376_v40  ;;  %5422 = vmatprep.subr.mxu1 %v6381_v41 }
  0xcf   :  { %5435 = vmatpush3.msra.mxu0 %v6376_v40  ;;  %5423 = vmatpush3.msra.mxu1 %v6381_v41 }
  0xd0   :  { %5436 = vmatprep.subr.mxu0 %v6388_v43 }
  0xd1   :  { %5437 = vmatpush3.msra.mxu0 %v6388_v43 }
 0x15c   :  { %v5300_v44 = vpop.f32.mrf.mxu0  ;;  %v5314_v45 = vpop.f32.mrf.mxu1 }
 0x15d   :  { %v319_v22 = vadd.f32 %v5314_v45, %v5300_v44 }
 0x15e   :  { %v216_v46 = vpop.f32.mrf.mxu0  ;;  %v313_v49 = vpop.f32.mrf.mxu1 }
 0x15f   :  { %v314_v43 = vadd.f32 %v313_v49, %v216_v46 }
 0x162   :  { %v5303_v54 = vpop.f32.mrf.mxu0  ;;  %v5317_v55 = vpop.f32.mrf.mxu1 }
 0x163   :  { %v329_v29 = vadd.f32 %v5317_v55, %v5303_v54 }
 0x164   :  { %v226_v56 = vpop.f32.mrf.mxu0  ;;  %v323_v57 = vpop.f32.mrf.mxu1 }
 0x165   :  { %v324_v27 = vadd.f32 %v323_v57, %v226_v56 }
 0x167   :  { %v5328_v58 = vpop.f32.mrf.mxu0 }
 0x168   :  { %v459_v40 = vadd.f32 %v5328_v58, %v319_v22 }
 0x169   :  { %v439_v62 = vpop.f32.mrf.mxu0  ;;  %v5342_v63 = vpop.f32.mrf.mxu1 }
 0x16a   :  { %v458_v35 = vadd.f32 %v439_v62, %v314_v43  ;;  %v589_v26 = vadd.f32 %v5342_v63, %v459_v40 }
 0x16b   :  { %v569_v1 = vpop.f32.mrf.mxu1 }
 0x16c   :  { %v588_v13 = vadd.f32 %v569_v1, %v458_v35 }
 0x16d   :  { %v5331_v4 = vpop.f32.mrf.mxu0 }
 0x16e   :  { %v461_v24 = vadd.f32 %v5331_v4, %v329_v29 }
 0x16f   :  { %v449_v9 = vpop.f32.mrf.mxu0  ;;  %v5345_v12 = vpop.f32.mrf.mxu1 }
 0x170   :  { %v460_v10 = vadd.f32 %v449_v9, %v324_v27  ;;  %v591_v5 = vadd.f32 %v5345_v12, %v461_v24 }
 0x171   :  { %v579_v14 = vpop.f32.mrf.mxu1 }
 0x172   :  { %v590_v45 = vadd.f32 %v579_v14, %v460_v10 }
 0x173   :  { %v5356_v16 = vpop.f32.mrf.mxu0 }
 0x174   :  { %v719_v11 = vadd.f32 %v5356_v16, %v589_v26 }
 0x175   :  { %v699_v23 = vpop.f32.mrf.mxu0  ;;  %v5370_v19 = vpop.f32.mrf.mxu1 }
 0x176   :  { %v718_v3 = vadd.f32 %v699_v23, %v588_v13  ;;  %v849_v59 = vadd.f32 %v5370_v19, %v719_v11 }
 0x177   :  { %v829_v32 = vpop.f32.mrf.mxu1 }
 0x178   :  { %v848_v43 = vadd.f32 %v829_v32, %v718_v3 }
 0x179   :  { %v5359_v28 = vpop.f32.mrf.mxu0 }
 0x17a   :  { %v721_v46 = vadd.f32 %v5359_v28, %v591_v5  ;;  %v6399_v5 = vld [vmem:[%s7025_s7] ss:$0 sm:$0xff] }
 0x17b   :  { %v709_v21 = vpop.f32.mrf.mxu0 }
 0x17c   :  { %v720_v55 = vadd.f32 %v709_v21, %v590_v45 }
 0x17d   :  { %v5373_v18 = vpop.f32.mrf.mxu1 }
 0x17e   :  { %v851_v29 = vadd.f32 %v5373_v18, %v721_v46 }
 0x17f   :  { %v839_v60 = vpop.f32.mrf.mxu1  ;;  %v5384_v44 = vpop.f32.mrf.mxu0 }
 0x180   :  { %v979_v58 = vadd.f32 %v5384_v44, %v849_v59  ;;  %v850_v26 = vadd.f32 %v839_v60, %v720_v55 }
 0x181   :  { %v959_v49 = vpop.f32.mrf.mxu0  ;;  %v5398_v54 = vpop.f32.mrf.mxu1 }
 0x182   :  { %v978_v57 = vadd.f32 %v959_v49, %v848_v43  ;;  %v1109_v62 = vadd.f32 %v5398_v54, %v979_v58 }
 0x183   :  { %v1089_v56 = vpop.f32.mrf.mxu1 }
 0x184   :  { %v5387_v40 = vpop.f32.mrf.mxu0  ;;  %v1108_v63 = vadd.f32 %v1089_v56, %v978_v57  ;;  %v6539_v57 = vld [vmem:[%s7024_s6 + $0x80] sm:$0xff] }
 0x185   :  { %v5401_v27 = vpop.f32.mrf.mxu1  ;;  %v981_v24 = vadd.f32 %v5387_v40, %v851_v29  ;;  %v6521_v40 = vld [vmem:[%s7024_s6 + $0x90] sm:$0xff]  ;;  %v6532_v29 = vld [vmem:[%s7024_s6 + $0x88] sm:$0xff] }
 0x186   :  { %v969_v35 = vpop.f32.mrf.mxu0 }
 0x187   :  { %v980_v1 = vadd.f32 %v969_v35, %v850_v26  ;;  %v1099_v10 = vpop.f32.mrf.mxu1  ;;  %v1111_v21 = vadd.f32 %v5401_v27, %v981_v24  ;;  %v6550_v35 = vld [vmem:[%s7024_s6 + $0xb8] sm:$0xff]  ;;  %v6557_v27 = vld [vmem:[%s7024_s6 + $0xb0] sm:$0xff]  ;;  %v6568_v26 = vld [vmem:[%s7024_s6 + $0xa8] sm:$0xff] }
 0x188   :  { %v5412_v13 = vpop.f32.mrf.mxu0  ;;  %v6586_v24 = vld [vmem:[%s7024_s6 + $0xd8] sm:$0xff] }
 0x189   :  { %v1239_v3 = vadd.f32 %v5412_v13, %v1109_v62  ;;  %v1110_v32 = vadd.f32 %v1099_v10, %v980_v1  ;;  %v6575_v62 = vld [vmem:[%s7024_s6 + $0xa0] sm:$0xff]  ;;  %v6593_v13 = vld [vmem:[%s7024_s6 + $0xd0] sm:$0xff] }
 0x18a   :  { %v1219_v59 = vpop.f32.mrf.mxu0  ;;  %v6611_v1 = vld [vmem:[%s7024_s6 + $0xc0] sm:$0xff]  ;;  %v6629_v10 = vld [vmem:[%s7024_s6 + $0xf0] sm:$0xff] }
 0x18b   :  { %v1238_v11 = vadd.f32 %v1219_v59, %v1108_v63  ;;  %v1249_v18 = vadd.f32 %v6399_v5, %v1239_v3  ;;  %v6604_v63 = vld [vmem:[%s7024_s6 + $0xc8] sm:$0xff]  ;;  %7089 = vst [vmem:[#allocation24_spill] sm:$0xff] %v6611_v1  ;;  %v6622_v3 = vld [vmem:[%s7024_s6 + $0xf8] sm:$0xff]  ;;  %7091 = vst [vmem:[#allocation26_spill] sm:$0xff] %v6629_v10 }
 0x18c   :  { %v5415_v28 = vpop.f32.mrf.mxu0  ;;  %7090 = vst [vmem:[#allocation25_spill] sm:$0xff] %v6622_v3  ;;  %v6640_v59 = vld [vmem:[%s7024_s6 + $0xe8] sm:$0xff] }
 0x18d   :  { %v1248_v60 = vadd.f32 %v6399_v5, %v1238_v11  ;;  %v1241_v4 = vadd.f32 %v5415_v28, %v1111_v21  ;;  %v6405_v16 = vmax.f32 %v1249_v18, 0.0  ;;  %7092 = vst [vmem:[#allocation27_spill] sm:$0xff] %v6640_v59  ;;  %v6647_v21 = vld [vmem:[%s7024_s6 + $0xe0] sm:$0xff]  ;;  %v6658_v11 = vld [vmem:[%s7024_s6 + $0x118] sm:$0xff]  ;;  %v6665_v18 = vld [vmem:[%s7024_s6 + $0x110] sm:$0xff] }
 0x18e   :  { %v1229_v9 = vpop.f32.mrf.mxu0  ;;  %7093 = vst [vmem:[#allocation28_spill] sm:$0xff] %v6647_v21  ;;  %7094 = vst [vmem:[#allocation29_spill] sm:$0xff] %v6658_v11  ;;  %v6676_v28 = vld [vmem:[%s7024_s6 + $0x108] sm:$0xff] }
 0x18f   :  { %v6403_v12 = vmax.f32 %v1248_v60, 0.0  ;;  %v1240_v14 = vadd.f32 %v1229_v9, %v1110_v32  ;;  %v1251_v22 = vadd.f32 %v6399_v5, %v1241_v4  ;;  %7095 = vst [vmem:[#allocation30_spill] sm:$0xff] %v6665_v18  ;;  %7096 = vst [vmem:[#allocation31_spill] sm:$0xff] %v6676_v28  ;;  %v6683_v32 = vld [vmem:[%s7024_s6 + $0x100] sm:$0xff] }
 0x190   :  { %7097 = vst [vmem:[#allocation32_spill] sm:$0xff] %v6683_v32 }
 0x191   :  { %v1250_v23 = vadd.f32 %v6399_v5, %v1240_v14  ;;  %5424 = vmatprep.mubr.msk.f32.mxu1 %vm137_vm0, %v6403_v12  ;;  %5438 = vmatprep.mubr.msk.f32.mxu0 %vm137_vm0, %v6403_v12  ;;  %v6419_v44 = vmax.f32 %v1251_v22, 0.0 }
 0x192   :  { %5425 = vmatmul.mubr.msk.f32.vlgmr.msra.gmra.mxu1 %vm137_vm0, %v6405_v16  ;;  %5439 = vmatmul.mubr.msk.f32.vlgmr.msra.gmra.mxu0 %vm137_vm0, %v6405_v16 }
 0x193   :  { %v6417_v19 = vmax.f32 %v1250_v23, 0.0 }
 0x195   :  { %5427 = vmatprep.mubr.msk.f32.mxu1 %vm137_vm0, %v6417_v19  ;;  %5441 = vmatprep.mubr.msk.f32.mxu0 %vm137_vm0, %v6417_v19 }
 0x196   :  { %5428 = vmatmul.mubr.msk.f32.gmra.mxu1 %vm137_vm0, %v6419_v44  ;;  %5442 = vmatmul.mubr.msk.f32.gmra.mxu0 %vm137_vm0, %v6419_v44 }
 0x197   :  { %5452 = vmatprep.mubr.msk.f32.mxu1 %vm137_vm0, %v6098_v6  ;;  %5466 = vmatprep.mubr.msk.f32.mxu0 %vm137_vm0, %v6100_v7  ;;  %v6436_v6 = vld [vmem:[%s7024_s6 + $0x58] sm:$0xff]  ;;  %v6445_v7 = vld [vmem:[%s7024_s6 + $0x50] sm:$0xff] }
 0x252   :  { %v5426_v45 = vpop.f32.mrf.mxu1  ;;  %v5440_v46 = vpop.f32.mrf.mxu0 }
 0x254   :  { %v1338_v49 = vpop.f32.mrf.mxu1  ;;  %v1428_v54 = vpop.f32.mrf.mxu0 }
 0x256   :  { %v5429_v43 = vpop.f32.mrf.mxu1  ;;  %v5443_v55 = vpop.f32.mrf.mxu0 }
 0x257   :  { %5444 = vmatprep.subr.mxu1 %v5443_v55  ;;  %5458 = vmatprep.subr.mxu0 %v5429_v43 }
 0x258   :  { %v1348_v58 = vpop.f32.mrf.mxu1  ;;  %v1438_v56 = vpop.f32.mrf.mxu0  ;;  %5445 = vmatpush3.msra.mxu1 %v5443_v55  ;;  %5459 = vmatpush3.msra.mxu0 %v5429_v43  ;;  %v7102_v55 = vld [vmem:[#allocation12_spill] sm:$0xff] }
 0x259   :  { %5446 = vmatprep.subr.mxu1 %v1438_v56  ;;  %5460 = vmatprep.subr.mxu0 %v1348_v58 }
 0x25a   :  { %5447 = vmatpush3.msra.mxu1 %v1438_v56  ;;  %5461 = vmatpush3.msra.mxu0 %v1348_v58  ;;  %v7103_v56 = vld [vmem:[#allocation14_spill] sm:$0xff] }
 0x25b   :  { %5448 = vmatprep.subr.mxu1 %v5440_v46  ;;  %5462 = vmatprep.subr.mxu0 %v5426_v45 }
 0x25c   :  { %5449 = vmatpush3.msra.mxu1 %v5440_v46  ;;  %5463 = vmatpush3.msra.mxu0 %v5426_v45  ;;  %v7098_v45 = vld [vmem:[#allocation6_spill] sm:$0xff]  ;;  %v7099_v46 = vld [vmem:[#allocation7_spill] sm:$0xff] }
 0x25d   :  { %5450 = vmatprep.subr.mxu1 %v1428_v54  ;;  %5464 = vmatprep.subr.mxu0 %v1338_v49 }
 0x25e   :  { %5451 = vmatpush3.msra.mxu1 %v1428_v54  ;;  %5465 = vmatpush3.msra.mxu0 %v1338_v49  ;;  %v7100_v49 = vld [vmem:[#allocation8_spill] sm:$0xff]  ;;  %v7101_v54 = vld [vmem:[#allocation9_spill] sm:$0xff] }
 0x25f   :  { %5453 = vmatmul.mubr.msk.f32.vlgmr.msra.gmra.mxu1 %vm137_vm0, %v6148_v38  ;;  %5467 = vmatmul.mubr.msk.f32.vlgmr.msra.gmra.mxu0 %vm137_vm0, %v6150_v39  ;;  %v6456_v38 = vld [vmem:[%s7024_s6 + $0x48] sm:$0xff]  ;;  %v6465_v39 = vld [vmem:[%s7024_s6 + $0x40] sm:$0xff] }
 0x260   :  { %5472 = vmatprep.subr.mxu1 %v6436_v6  ;;  %5455 = vmatprep.mubr.msk.f32.mxu1 %vm137_vm0, %v6159_v47  ;;  %v6476_v47 = vld [vmem:[%s7024_s6 + $0x78] sm:$0xff] }
 0x261   :  { %5473 = vmatpush3.msra.mxu1 %v6436_v6  ;;  %5469 = vmatprep.mubr.msk.f32.mxu0 %vm137_vm0, %v6161_v48  ;;  %v6485_v48 = vld [vmem:[%s7024_s6 + $0x70] sm:$0xff] }
 0x262   :  { %5474 = vmatprep.subr.mxu1 %v6445_v7 }
 0x263   :  { %5475 = vmatpush3.msra.mxu1 %v6445_v7  ;;  %5470 = vmatmul.mubr.msk.f32.gmra.mxu0 %vm137_vm0, %v6166_v51  ;;  %v6503_v51 = vld [vmem:[%s7024_s6 + $0x60] sm:$0xff] }
 0x264   :  { %5456 = vmatmul.mubr.msk.f32.gmra.mxu1 %vm137_vm0, %v6164_v50  ;;  %5476 = vmatprep.subr.mxu1 %v6456_v38  ;;  %v6496_v50 = vld [vmem:[%s7024_s6 + $0x68] sm:$0xff] }
 0x265   :  { %5477 = vmatpush3.msra.mxu1 %v6456_v38  ;;  %5480 = vmatprep.mubr.msk.f32.mxu1 %vm137_vm0, %v6403_v12 }
 0x266   :  { %5478 = vmatprep.subr.mxu1 %v6465_v39  ;;  %5494 = vmatprep.mubr.msk.f32.mxu0 %vm137_vm0, %v6185_v61  ;;  %v6514_v61 = vld [vmem:[%s7024_s6 + $0x98] sm:$0xff] }
 0x267   :  { %5479 = vmatpush3.msra.mxu1 %v6465_v39 }
 0x268   :  { %5481 = vmatmul.mubr.msk.f32.vlgmr.msra.gmra.mxu1 %vm137_vm0, %v6405_v16  ;;  %5500 = vmatprep.subr.mxu1 %v6476_v47 }
 0x269   :  { %5483 = vmatprep.mubr.msk.f32.mxu1 %vm137_vm0, %v6417_v19  ;;  %5501 = vmatpush3.msra.mxu1 %v6476_v47 }
 0x26a   :  { %5502 = vmatprep.subr.mxu1 %v6485_v48 }
 0x26b   :  { %5503 = vmatpush3.msra.mxu1 %v6485_v48 }
 0x26c   :  { %5484 = vmatmul.mubr.msk.f32.gmra.mxu1 %vm137_vm0, %v6419_v44  ;;  %5504 = vmatprep.subr.mxu1 %v6496_v50 }
 0x26d   :  { %5505 = vmatpush3.msra.mxu1 %v6496_v50  ;;  %5508 = vmatprep.mubr.msk.f32.mxu1 %vm137_vm0, %v6403_v12 }
 0x26e   :  { %5506 = vmatprep.subr.mxu1 %v6503_v51 }
 0x26f   :  { %5507 = vmatpush3.msra.mxu1 %v6503_v51 }
 0x270   :  { %5509 = vmatmul.mubr.msk.f32.vlgmr.msra.gmra.mxu1 %vm137_vm0, %v6405_v16  ;;  %5528 = vmatprep.subr.mxu1 %v6514_v61 }
 0x271   :  { %5511 = vmatprep.mubr.msk.f32.mxu1 %vm137_vm0, %v6417_v19  ;;  %5529 = vmatpush3.msra.mxu1 %v6514_v61 }
 0x272   :  { %5530 = vmatprep.subr.mxu1 %v6521_v40 }
 0x273   :  { %5531 = vmatpush3.msra.mxu1 %v6521_v40 }
 0x274   :  { %5512 = vmatmul.mubr.msk.f32.gmra.mxu1 %vm137_vm0, %v6419_v44  ;;  %5532 = vmatprep.subr.mxu1 %v6532_v29 }
 0x275   :  { %5533 = vmatpush3.msra.mxu1 %v6532_v29  ;;  %5536 = vmatprep.mubr.msk.f32.mxu1 %vm137_vm0, %v6403_v12 }
 0x276   :  { %5534 = vmatprep.subr.mxu1 %v6539_v57 }
 0x277   :  { %5535 = vmatpush3.msra.mxu1 %v6539_v57 }
 0x278   :  { %5537 = vmatmul.mubr.msk.f32.vlgmr.msra.gmra.mxu1 %vm137_vm0, %v6405_v16  ;;  %5556 = vmatprep.subr.mxu1 %v6550_v35 }
 0x279   :  { %5539 = vmatprep.mubr.msk.f32.mxu1 %vm137_vm0, %v6417_v19  ;;  %5557 = vmatpush3.msra.mxu1 %v6550_v35 }
 0x27a   :  { %5558 = vmatprep.subr.mxu1 %v6557_v27 }
 0x27b   :  { %5559 = vmatpush3.msra.mxu1 %v6557_v27 }
 0x27c   :  { %5540 = vmatmul.mubr.msk.f32.gmra.mxu1 %vm137_vm0, %v6419_v44  ;;  %5560 = vmatprep.subr.mxu1 %v6568_v26 }
 0x27d   :  { %5561 = vmatpush3.msra.mxu1 %v6568_v26  ;;  %5564 = vmatprep.mubr.msk.f32.mxu1 %vm137_vm0, %v6403_v12 }
 0x27e   :  { %5562 = vmatprep.subr.mxu1 %v6575_v62 }
 0x27f   :  { %5563 = vmatpush3.msra.mxu1 %v6575_v62 }
 0x280   :  { %5565 = vmatmul.mubr.msk.f32.vlgmr.msra.gmra.mxu1 %vm137_vm0, %v6405_v16  ;;  %5584 = vmatprep.subr.mxu1 %v6586_v24 }
 0x281   :  { %5567 = vmatprep.mubr.msk.f32.mxu1 %vm137_vm0, %v6417_v19  ;;  %5585 = vmatpush3.msra.mxu1 %v6586_v24 }
 0x282   :  { %5586 = vmatprep.subr.mxu1 %v6593_v13 }
 0x283   :  { %5587 = vmatpush3.msra.mxu1 %v6593_v13 }
 0x284   :  { %5568 = vmatmul.mubr.msk.f32.gmra.mxu1 %vm137_vm0, %v6419_v44  ;;  %5588 = vmatprep.subr.mxu1 %v6604_v63 }
 0x285   :  { %5589 = vmatpush3.msra.mxu1 %v6604_v63  ;;  %5592 = vmatprep.mubr.msk.f32.mxu1 %vm137_vm0, %v6403_v12 }
 0x286   :  { %5590 = vmatprep.subr.mxu1 %v6611_v1 }
 0x287   :  { %5591 = vmatpush3.msra.mxu1 %v6611_v1 }
 0x288   :  { %5593 = vmatmul.mubr.msk.f32.vlgmr.msra.gmra.mxu1 %vm137_vm0, %v6405_v16  ;;  %5612 = vmatprep.subr.mxu1 %v6622_v3 }
 0x289   :  { %5595 = vmatprep.mubr.msk.f32.mxu1 %vm137_vm0, %v6417_v19  ;;  %5613 = vmatpush3.msra.mxu1 %v6622_v3 }
 0x28a   :  { %5614 = vmatprep.subr.mxu1 %v6629_v10 }
 0x28b   :  { %5615 = vmatpush3.msra.mxu1 %v6629_v10 }
 0x28c   :  { %5596 = vmatmul.mubr.msk.f32.gmra.mxu1 %vm137_vm0, %v6419_v44  ;;  %5616 = vmatprep.subr.mxu1 %v6640_v59 }
 0x28d   :  { %5617 = vmatpush3.msra.mxu1 %v6640_v59  ;;  %5620 = vmatprep.mubr.msk.f32.mxu1 %vm137_vm0, %v6403_v12 }
 0x28e   :  { %5618 = vmatprep.subr.mxu1 %v6647_v21 }
 0x28f   :  { %5619 = vmatpush3.msra.mxu1 %v6647_v21 }
 0x290   :  { %5621 = vmatmul.mubr.msk.f32.vlgmr.msra.gmra.mxu1 %vm137_vm0, %v6405_v16  ;;  %5640 = vmatprep.subr.mxu1 %v6658_v11 }
 0x291   :  { %5623 = vmatprep.mubr.msk.f32.mxu1 %vm137_vm0, %v6417_v19  ;;  %5641 = vmatpush3.msra.mxu1 %v6658_v11 }
 0x292   :  { %5642 = vmatprep.subr.mxu1 %v6665_v18 }
 0x293   :  { %5643 = vmatpush3.msra.mxu1 %v6665_v18 }
 0x294   :  { %5624 = vmatmul.mubr.msk.f32.gmra.mxu1 %vm137_vm0, %v6419_v44  ;;  %5644 = vmatprep.subr.mxu1 %v6676_v28 }
 0x295   :  { %5645 = vmatpush3.msra.mxu1 %v6676_v28  ;;  %5648 = vmatprep.mubr.msk.f32.mxu1 %vm137_vm0, %v6403_v12 }
 0x296   :  { %5646 = vmatprep.subr.mxu1 %v6683_v32 }
 0x297   :  { %5647 = vmatpush3.msra.mxu1 %v6683_v32 }
 0x298   :  { %5649 = vmatmul.mubr.msk.f32.vlgmr.msra.gmra.mxu1 %vm137_vm0, %v6405_v16  ;;  %5668 = vmatprep.subr.mxu1 %v6343_v30 }
 0x299   :  { %5651 = vmatprep.mubr.msk.f32.mxu1 %vm137_vm0, %v6417_v19  ;;  %5669 = vmatpush3.msra.mxu1 %v6343_v30 }
 0x29a   :  { %5670 = vmatprep.subr.mxu1 %v6357_v33 }
 0x29b   :  { %5671 = vmatpush3.msra.mxu1 %v6357_v33 }
 0x29c   :  { %5652 = vmatmul.mubr.msk.f32.gmra.mxu1 %vm137_vm0, %v6419_v44  ;;  %5672 = vmatprep.subr.mxu1 %v6371_v37 }
 0x29d   :  { %5673 = vmatpush3.msra.mxu1 %v6371_v37 }
 0x29e   :  { %5674 = vmatprep.subr.mxu1 %v6381_v41 }
 0x29f   :  { %5675 = vmatpush3.msra.mxu1 %v6381_v41 }
 0x31f   :  { %v6707_v60 = vpop.f32.mrf.mxu1 }
 0x321   :  { %v6709_v4 = vpop.f32.mrf.mxu1 }
 0x324   :  { %v6711_v30 = vpop.f32.mrf.mxu1 }
 0x326   :  { %v6713_v9 = vpop.f32.mrf.mxu1 }
 0x328   :  { %v5482_v33 = vpop.f32.mrf.mxu1 }
 0x32a   :  { %v1688_v12 = vpop.f32.mrf.mxu1 }
 0x32c   :  { %v5485_v14 = vpop.f32.mrf.mxu1 }
 0x32d   :  { %5486 = vmatprep.subr.mxu0 %v5485_v14 }
 0x32e   :  { %v1698_v16 = vpop.f32.mrf.mxu1  ;;  %5487 = vmatpush3.msra.mxu0 %v5485_v14 }
 0x32f   :  { %5488 = vmatprep.subr.mxu0 %v1698_v16 }
 0x330   :  { %5489 = vmatpush3.msra.mxu0 %v1698_v16  ;;  %v5510_v37 = vpop.f32.mrf.mxu1  ;;  %v7105_v16 = vld [vmem:[#allocation11_spill] sm:$0xff] }
 0x331   :  { %5490 = vmatprep.subr.mxu0 %v5482_v33 }
 0x332   :  { %5491 = vmatpush3.msra.mxu0 %v5482_v33  ;;  %v1867_v41 = vpop.f32.mrf.mxu1 }
 0x333   :  { %5492 = vmatprep.subr.mxu0 %v1688_v12 }
 0x334   :  { %5493 = vmatpush3.msra.mxu0 %v1688_v12  ;;  %v5513_v22 = vpop.f32.mrf.mxu1  ;;  %v7104_v12 = vld [vmem:[#allocation10_spill] sm:$0xff] }
 0x335   :  { %5495 = vmatmul.mubr.msk.f32.vlgmr.msra.gmra.mxu0 %vm137_vm0, %v6191_v0  ;;  %5514 = vmatprep.subr.mxu0 %v5513_v22 }
 0x336   :  { %v1877_v23 = vpop.f32.mrf.mxu1  ;;  %5515 = vmatpush3.msra.mxu0 %v5513_v22  ;;  %5497 = vmatprep.mubr.msk.f32.mxu0 %vm137_vm0, %v6211_v15  ;;  %v7107_v22 = vld [vmem:[#allocation15_spill] sm:$0xff] }
 0x337   :  { %5516 = vmatprep.subr.mxu0 %v1877_v23 }
 0x338   :  { %5517 = vmatpush3.msra.mxu0 %v1877_v23  ;;  %v5538_v19 = vpop.f32.mrf.mxu1  ;;  %v7108_v23 = vld [vmem:[#allocation16_spill] sm:$0xff] }
 0x339   :  { %5498 = vmatmul.mubr.msk.f32.gmra.mxu0 %vm137_vm0, %v6214_v17  ;;  %5518 = vmatprep.subr.mxu0 %v5510_v37 }
 0x33a   :  { %5519 = vmatpush3.msra.mxu0 %v5510_v37  ;;  %v2046_v44 = vpop.f32.mrf.mxu1  ;;  %5522 = vmatprep.mubr.msk.f32.mxu0 %vm137_vm0, %v6196_v2 }
 0x33b   :  { %5520 = vmatprep.subr.mxu0 %v1867_v41 }
 0x33c   :  { %5521 = vmatpush3.msra.mxu0 %v1867_v41  ;;  %v5541_v0 = vpop.f32.mrf.mxu1  ;;  %v7106_v41 = vld [vmem:[#allocation13_spill] sm:$0xff] }
 0x33d   :  { %5523 = vmatmul.mubr.msk.f32.vlgmr.msra.gmra.mxu0 %vm137_vm0, %v6202_v8  ;;  %5542 = vmatprep.subr.mxu0 %v5541_v0 }
 0x33e   :  { %v2056_v15 = vpop.f32.mrf.mxu1  ;;  %5543 = vmatpush3.msra.mxu0 %v5541_v0  ;;  %5525 = vmatprep.mubr.msk.f32.mxu0 %vm137_vm0, %v6216_v20  ;;  %v7111_v0 = vld [vmem:[#allocation18_spill] sm:$0xff] }
 0x33f   :  { %5544 = vmatprep.subr.mxu0 %v2056_v15 }
 0x340   :  { %5545 = vmatpush3.msra.mxu0 %v2056_v15  ;;  %v5566_v17 = vpop.f32.mrf.mxu1  ;;  %v7112_v15 = vld [vmem:[#allocation21_spill] sm:$0xff] }
 0x341   :  { %5526 = vmatmul.mubr.msk.f32.gmra.mxu0 %vm137_vm0, %v6225_v25  ;;  %5546 = vmatprep.subr.mxu0 %v5538_v19 }
 0x342   :  { %5547 = vmatpush3.msra.mxu0 %v5538_v19  ;;  %v2225_v2 = vpop.f32.mrf.mxu1  ;;  %5550 = vmatprep.mubr.msk.f32.mxu0 %vm137_vm0, %v6237_v31  ;;  %v7109_v19 = vld [vmem:[#allocation17_spill] sm:$0xff] }
 0x343   :  { %5548 = vmatprep.subr.mxu0 %v2046_v44 }
 0x344   :  { %5549 = vmatpush3.msra.mxu0 %v2046_v44  ;;  %v5569_v8 = vpop.f32.mrf.mxu1  ;;  %v7110_v44 = vld [vmem:[#allocation20_spill] sm:$0xff] }
 0x345   :  { %5551 = vmatmul.mubr.msk.f32.vlgmr.msra.gmra.mxu0 %vm137_vm0, %v6243_v34  ;;  %5570 = vmatprep.subr.mxu0 %v5569_v8 }
 0x346   :  { %v2235_v20 = vpop.f32.mrf.mxu1  ;;  %5571 = vmatpush3.msra.mxu0 %v5569_v8  ;;  %5553 = vmatprep.mubr.msk.f32.mxu0 %vm137_vm0, %v6264_v52  ;;  %v7115_v8 = vld [vmem:[#allocation23_spill] sm:$0xff] }
 0x347   :  { %5572 = vmatprep.subr.mxu0 %v2235_v20 }
 0x348   :  { %5573 = vmatpush3.msra.mxu0 %v2235_v20  ;;  %v5594_v25 = vpop.f32.mrf.mxu1  ;;  %v5468_v20 = vpop.f32.mrf.mxu0 }
 0x349   :  { %5554 = vmatmul.mubr.msk.f32.gmra.mxu0 %vm137_vm0, %v6266_v53  ;;  %5574 = vmatprep.subr.mxu0 %v5566_v17 }
 0x34a   :  { %5575 = vmatpush3.msra.mxu0 %v5566_v17  ;;  %v2404_v31 = vpop.f32.mrf.mxu1  ;;  %5578 = vmatprep.mubr.msk.f32.mxu0 %vm137_vm0, %v6248_v36  ;;  %v7113_v17 = vld [vmem:[#allocation19_spill] sm:$0xff] }
 0x34b   :  { %5576 = vmatprep.subr.mxu0 %v2225_v2 }
 0x34c   :  { %5577 = vmatpush3.msra.mxu0 %v2225_v2  ;;  %v5597_v34 = vpop.f32.mrf.mxu1  ;;  %v7114_v2 = vld [vmem:[#allocation22_spill] sm:$0xff] }
 0x34d   :  { %5579 = vmatmul.mubr.msk.f32.vlgmr.msra.gmra.mxu0 %vm137_vm0, %v6254_v42  ;;  %5598 = vmatprep.subr.mxu0 %v5597_v34 }
 0x34e   :  { %v2414_v52 = vpop.f32.mrf.mxu1  ;;  %5599 = vmatpush3.msra.mxu0 %v5597_v34  ;;  %5581 = vmatprep.mubr.msk.f32.mxu0 %vm137_vm0, %v7098_v45 }
 0x34f   :  { %5600 = vmatprep.subr.mxu0 %v2414_v52 }
 0x350   :  { %5601 = vmatpush3.msra.mxu0 %v2414_v52  ;;  %v5622_v53 = vpop.f32.mrf.mxu1 }
 0x351   :  { %5582 = vmatmul.mubr.msk.f32.gmra.mxu0 %vm137_vm0, %v7099_v46  ;;  %5602 = vmatprep.subr.mxu0 %v5594_v25 }
 0x352   :  { %5603 = vmatpush3.msra.mxu0 %v5594_v25  ;;  %v2583_v36 = vpop.f32.mrf.mxu1  ;;  %5606 = vmatprep.mubr.msk.f32.mxu0 %vm137_vm0, %v7100_v49  ;;  %v1598_v25 = vpop.f32.mrf.mxu0 }
 0x353   :  { %5604 = vmatprep.subr.mxu0 %v2404_v31 }
 0x354   :  { %5605 = vmatpush3.msra.mxu0 %v2404_v31  ;;  %v5625_v42 = vpop.f32.mrf.mxu1  ;;  %v5471_v31 = vpop.f32.mrf.mxu0 }
 0x355   :  { %5607 = vmatmul.mubr.msk.f32.vlgmr.msra.gmra.mxu0 %vm137_vm0, %v7101_v54  ;;  %5626 = vmatprep.subr.mxu0 %v5625_v42 }
 0x356   :  { %v2593_v43 = vpop.f32.mrf.mxu1  ;;  %5627 = vmatpush3.msra.mxu0 %v5625_v42  ;;  %5609 = vmatprep.mubr.msk.f32.mxu0 %vm137_vm0, %v7102_v55  ;;  %v1608_v34 = vpop.f32.mrf.mxu0 }
 0x357   :  { %5628 = vmatprep.subr.mxu0 %v2593_v43  ;;  %v1609_v32 = vadd.f32 %v1608_v34, %v6713_v9 }
 0x358   :  { %5629 = vmatpush3.msra.mxu0 %v2593_v43  ;;  %v5650_v58 = vpop.f32.mrf.mxu1 }
 0x359   :  { %5610 = vmatmul.mubr.msk.f32.gmra.mxu0 %vm137_vm0, %v7103_v56  ;;  %5630 = vmatprep.subr.mxu0 %v5622_v53 }
 0x35a   :  { %5631 = vmatpush3.msra.mxu0 %v5622_v53  ;;  %v2762_v33 = vpop.f32.mrf.mxu1  ;;  %5634 = vmatprep.mubr.msk.f32.mxu0 %vm137_vm0, %v7104_v12 }
 0x35b   :  { %5632 = vmatprep.subr.mxu0 %v2583_v36 }
 0x35c   :  { %5633 = vmatpush3.msra.mxu0 %v2583_v36  ;;  %v5653_v14 = vpop.f32.mrf.mxu1 }
 0x35d   :  { %5635 = vmatmul.mubr.msk.f32.vlgmr.msra.gmra.mxu0 %vm137_vm0, %v7105_v16  ;;  %5654 = vmatprep.subr.mxu0 %v5653_v14 }
 0x35e   :  { %v2772_v37 = vpop.f32.mrf.mxu1  ;;  %5655 = vmatpush3.msra.mxu0 %v5653_v14  ;;  %5637 = vmatprep.mubr.msk.f32.mxu0 %vm137_vm0, %v7106_v41 }
 0x35f   :  { %5656 = vmatprep.subr.mxu0 %v2772_v37 }
 0x360   :  { %5657 = vmatpush3.msra.mxu0 %v2772_v37 }
 0x361   :  { %5638 = vmatmul.mubr.msk.f32.gmra.mxu0 %vm137_vm0, %v7107_v22  ;;  %5658 = vmatprep.subr.mxu0 %v5650_v58  ;;  %v1604_v22 = vadd.f32 %v5468_v20, %v6707_v60 }
 0x362   :  { %5659 = vmatpush3.msra.mxu0 %v5650_v58  ;;  %5662 = vmatprep.mubr.msk.f32.mxu0 %vm137_vm0, %v7108_v23 }
 0x363   :  { %5660 = vmatprep.subr.mxu0 %v2762_v33 }
 0x364   :  { %5661 = vmatpush3.msra.mxu0 %v2762_v33 }
 0x365   :  { %5663 = vmatmul.mubr.msk.f32.vlgmr.msra.gmra.mxu0 %vm137_vm0, %v7109_v19  ;;  %5682 = vmatprep.subr.mxu0 %v7110_v44  ;;  %v1599_v19 = vadd.f32 %v1598_v25, %v6709_v4 }
 0x366   :  { %5665 = vmatprep.mubr.msk.f32.mxu0 %vm137_vm0, %v7111_v0  ;;  %5683 = vmatpush3.msra.mxu0 %v7110_v44 }
 0x367   :  { %5684 = vmatprep.subr.mxu0 %v7112_v15 }
 0x368   :  { %5685 = vmatpush3.msra.mxu0 %v7112_v15  ;;  %v1614_v15 = vadd.f32 %v5471_v31, %v6711_v30 }
 0x369   :  { %5666 = vmatmul.mubr.msk.f32.gmra.mxu0 %vm137_vm0, %v7113_v17  ;;  %5686 = vmatprep.subr.mxu0 %v7114_v2 }
 0x36a   :  { %5687 = vmatpush3.msra.mxu0 %v7114_v2 }
 0x36b   :  { %5688 = vmatprep.subr.mxu0 %v7115_v8 }
 0x36c   :  { %5689 = vmatpush3.msra.mxu0 %v7115_v8 }
 0x3f5   :  { %v5496_v52 = vpop.f32.mrf.mxu0 }
 0x3f6   :  { %v1793_v44 = vadd.f32 %v5496_v52, %v1604_v22 }
 0x3f7   :  { %v1773_v45 = vpop.f32.mrf.mxu0 }
 0x3f8   :  { %v1792_v17 = vadd.f32 %v1773_v45, %v1599_v19 }
 0x3f9   :  { %v5499_v53 = vpop.f32.mrf.mxu0 }
 0x3fa   :  { %v1795_v28 = vadd.f32 %v5499_v53, %v1614_v15 }
 0x3fb   :  { %v1783_v46 = vpop.f32.mrf.mxu0 }
 0x3fc   :  { %v1794_v59 = vadd.f32 %v1783_v46, %v1609_v32 }
 0x3fd   :  { %v5524_v36 = vpop.f32.mrf.mxu0 }
 0x3fe   :  { %v1972_v2 = vadd.f32 %v5524_v36, %v1793_v44 }
 0x3ff   :  { %v1952_v49 = vpop.f32.mrf.mxu0 }
 0x400   :  { %v1971_v18 = vadd.f32 %v1952_v49, %v1792_v17  ;;  %v5952_v17 = vld [vmem:[#allocation3 + $0x28] sm:$0xff] }
 0x401   :  { %v5527_v42 = vpop.f32.mrf.mxu0 }
 0x402   :  { %v1974_v10 = vadd.f32 %v5527_v42, %v1795_v28 }
 0x403   :  { %v1962_v54 = vpop.f32.mrf.mxu0 }
 0x404   :  { %v1973_v1 = vadd.f32 %v1962_v54, %v1794_v59 }
 0x405   :  { %v5552_v43 = vpop.f32.mrf.mxu0 }
 0x406   :  { %v2151_v11 = vadd.f32 %v5552_v43, %v1972_v2  ;;  %v5953_v2 = vld [vmem:[#allocation3 + $0x8] sm:$0xff] }
 0x407   :  { %v2131_v55 = vpop.f32.mrf.mxu0 }
 0x408   :  { %v2150_v3 = vadd.f32 %v2131_v55, %v1971_v18 }
 0x409   :  { %v5555_v58 = vpop.f32.mrf.mxu0 }
 0x40a   :  { %v2153_v4 = vadd.f32 %v5555_v58, %v1974_v10 }
 0x40b   :  { %v2141_v56 = vpop.f32.mrf.mxu0 }
 0x40c   :  { %v2152_v30 = vadd.f32 %v2141_v56, %v1973_v1 }
 0x40d   :  { %v5580_v33 = vpop.f32.mrf.mxu0 }
 0x40e   :  { %v2330_v60 = vadd.f32 %v5580_v33, %v2151_v11 }
 0x40f   :  { %v2310_v12 = vpop.f32.mrf.mxu0 }
 0x410   :  { %v2329_v25 = vadd.f32 %v2310_v12, %v2150_v3  ;;  %v5951_v12 = vld [vmem:[#allocation3] sm:$0xff] }
 0x411   :  { %v5583_v14 = vpop.f32.mrf.mxu0 }
 0x412   :  { %v2332_v31 = vadd.f32 %v5583_v14, %v2153_v4  ;;  %v5957_v4 = vld [vmem:[#allocation3 + $0x38] sm:$0xff] }
 0x413   :  { %v2320_v16 = vpop.f32.mrf.mxu0 }
 0x414   :  { %v2331_v9 = vadd.f32 %v2320_v16, %v2152_v30 }
 0x415   :  { %v5608_v37 = vpop.f32.mrf.mxu0 }
 0x416   :  { %v2509_v52 = vadd.f32 %v5608_v37, %v2330_v60  ;;  %v5955_v60 = vld [vmem:[#allocation3 + $0x10] sm:$0xff] }
 0x417   :  { %v2489_v41 = vpop.f32.mrf.mxu0 }
 0x418   :  { %v2508_v45 = vadd.f32 %v2489_v41, %v2329_v25 }
 0x419   :  { %v5611_v23 = vpop.f32.mrf.mxu0 }
 0x41a   :  { %v2511_v34 = vadd.f32 %v5611_v23, %v2332_v31  ;;  %v5960_v31 = vld [vmem:[#allocation3 + $0x50] sm:$0xff] }
 0x41b   :  { %v2499_v0 = vpop.f32.mrf.mxu0 }
 0x41c   :  { %v2510_v32 = vadd.f32 %v2499_v0, %v2331_v9  ;;  %v5962_v9 = vld [vmem:[#allocation3 + $0x60] sm:$0xff] }
 0x41d   :  { %v5636_v8 = vpop.f32.mrf.mxu0 }
 0x41e   :  { %v2688_v36 = vadd.f32 %v5636_v8, %v2509_v52  ;;  %v5954_v8 = vld [vmem:[#allocation3 + $0x30] sm:$0xff] }
 0x41f   :  { %v2668_v21 = vpop.f32.mrf.mxu0 }
 0x420   :  { %v2687_v53 = vadd.f32 %v2668_v21, %v2508_v45 }
 0x421   :  { %v5639_v20 = vpop.f32.mrf.mxu0 }
 0x422   :  { %v2690_v28 = vadd.f32 %v5639_v20, %v2511_v34  ;;  %v5956_v20 = vld [vmem:[#allocation3 + $0x18] sm:$0xff] }
 0x423   :  { %v2678_v22 = vpop.f32.mrf.mxu0 }
 0x424   :  { %v2689_v10 = vadd.f32 %v2678_v22, %v2510_v32  ;;  %v5959_v22 = vld [vmem:[#allocation3 + $0x48] sm:$0xff] }
 0x425   :  { %v5664_v19 = vpop.f32.mrf.mxu0 }
 0x426   :  { %v2867_v49 = vadd.f32 %v5664_v19, %v2688_v36  ;;  %v5961_v36 = vld [vmem:[#allocation3 + $0x58] sm:$0xff] }
 0x427   :  { %v2847_v43 = vpop.f32.mrf.mxu0 }
 0x428   :  { %v2866_v18 = vadd.f32 %v2847_v43, %v2687_v53  ;;  %v2871_v11 = vadd.f32 %v6399_v5, %v2867_v49  ;;  %v5963_v53 = vld [vmem:[#allocation3 + $0x68] sm:$0xff]  ;;  %v5964_v43 = vld [vmem:[#allocation3 + $0x70] sm:$0xff] }
 0x429   :  { %v5667_v59 = vpop.f32.mrf.mxu0 }
 0x42a   :  { %v2870_v3 = vadd.f32 %v6399_v5, %v2866_v18  ;;  %v2869_v46 = vadd.f32 %v5667_v59, %v2690_v28  ;;  %v6785_v55 = vmax.f32 %v2871_v11, 0.0  ;;  %v5965_v28 = vld [vmem:[#allocation3 + $0x78] sm:$0xff]  ;;  %v5966_v11 = vld [vmem:[#allocation3 + $0x80] sm:$0xff] }
 0x42b   :  { %v2857_v1 = vpop.f32.mrf.mxu0 }
 0x42c   :  { %v6783_v42 = vmax.f32 %v2870_v3, 0.0  ;;  %v2868_v54 = vadd.f32 %v2857_v1, %v2689_v10  ;;  %v2873_v21 = vadd.f32 %v6399_v5, %v2869_v46  ;;  %v5967_v10 = vld [vmem:[#allocation3 + $0x88] sm:$0xff]  ;;  %v5968_v46 = vld [vmem:[#allocation3 + $0x90] sm:$0xff] }
 0x42e   :  { %v2872_v58 = vadd.f32 %v6399_v5, %v2868_v54  ;;  %5676 = vmatprep.mubr.msk.f32.mxu1 %vm137_vm0, %v6783_v42  ;;  %5690 = vmatprep.mubr.msk.f32.mxu0 %vm137_vm0, %v6783_v42  ;;  %v6799_v33 = vmax.f32 %v2873_v21, 0.0  ;;  %v5950_v5 = vld [vmem:[#allocation3 + $0x20] sm:$0xff] }
 0x42f   :  { %5677 = vmatmul.mubr.msk.f32.vlgmr.msra.gmra.mxu1 %vm137_vm0, %v6785_v55  ;;  %5691 = vmatmul.mubr.msk.f32.vlgmr.msra.gmra.mxu0 %vm137_vm0, %v6785_v55 }
 0x430   :  { %v6797_v56 = vmax.f32 %v2872_v58, 0.0  ;;  %v5971_v58 = vld [vmem:[#allocation3 + $0xa8] sm:$0xff] }
 0x432   :  { %5679 = vmatprep.mubr.msk.f32.mxu1 %vm137_vm0, %v6797_v56  ;;  %5693 = vmatprep.mubr.msk.f32.mxu0 %vm137_vm0, %v6797_v56 }
 0x433   :  { %5680 = vmatmul.mubr.msk.f32.gmra.mxu1 %vm137_vm0, %v6799_v33  ;;  %5694 = vmatmul.mubr.msk.f32.gmra.mxu0 %vm137_vm0, %v6799_v33 }
 0x434   :  { %5704 = vmatprep.mubr.msk.f32.mxu1 %vm137_vm0, %v5950_v5  ;;  %5718 = vmatprep.mubr.msk.f32.mxu0 %vm137_vm0, %v5951_v12  ;;  %v5973_v12 = vld [vmem:[#allocation3 + $0xb8] sm:$0xff] }
 0x4ef   :  { %v5678_v14 = vpop.f32.mrf.mxu1  ;;  %v5692_v16 = vpop.f32.mrf.mxu0 }
 0x4f1   :  { %v2956_v37 = vpop.f32.mrf.mxu1  ;;  %v3041_v41 = vpop.f32.mrf.mxu0 }
 0x4f3   :  { %v5681_v23 = vpop.f32.mrf.mxu1  ;;  %v5695_v44 = vpop.f32.mrf.mxu0 }
 0x4f4   :  { %5696 = vmatprep.subr.mxu1 %v5695_v44  ;;  %5710 = vmatprep.subr.mxu0 %v5681_v23 }
 0x4f5   :  { %v2966_v0 = vpop.f32.mrf.mxu1  ;;  %v3051_v15 = vpop.f32.mrf.mxu0  ;;  %5697 = vmatpush3.msra.mxu1 %v5695_v44  ;;  %5711 = vmatpush3.msra.mxu0 %v5681_v23  ;;  %v5976_v44 = vld [vmem:[#allocation3 + $0xd0] sm:$0xff] }
 0x4f6   :  { %5698 = vmatprep.subr.mxu1 %v3051_v15  ;;  %5712 = vmatprep.subr.mxu0 %v2966_v0 }
 0x4f7   :  { %5699 = vmatpush3.msra.mxu1 %v3051_v15  ;;  %5713 = vmatpush3.msra.mxu0 %v2966_v0  ;;  %v5977_v15 = vld [vmem:[#allocation3 + $0xd8] sm:$0xff] }
 0x4f8   :  { %5700 = vmatprep.subr.mxu1 %v5692_v16  ;;  %5714 = vmatprep.subr.mxu0 %v5678_v14 }
 0x4f9   :  { %5701 = vmatpush3.msra.mxu1 %v5692_v16  ;;  %5715 = vmatpush3.msra.mxu0 %v5678_v14  ;;  %v5974_v16 = vld [vmem:[#allocation3 + $0xc0] sm:$0xff] }
 0x4fa   :  { %5702 = vmatprep.subr.mxu1 %v3041_v41  ;;  %5716 = vmatprep.subr.mxu0 %v2956_v37 }
 0x4fb   :  { %5703 = vmatpush3.msra.mxu1 %v3041_v41  ;;  %5717 = vmatpush3.msra.mxu0 %v2956_v37  ;;  %v5975_v41 = vld [vmem:[#allocation3 + $0xc8] sm:$0xff] }
 0x4fc   :  { %5705 = vmatmul.mubr.msk.f32.vlgmr.msra.gmra.mxu1 %vm137_vm0, %v5952_v17  ;;  %5719 = vmatmul.mubr.msk.f32.vlgmr.msra.gmra.mxu0 %vm137_vm0, %v5953_v2  ;;  %v5978_v2 = vld [vmem:[#allocation3 + $0xe0] sm:$0xff] }
 0x4fd   :  { %5724 = vmatprep.subr.mxu1 %v6436_v6  ;;  %5707 = vmatprep.mubr.msk.f32.mxu1 %vm137_vm0, %v5954_v8 }
 0x4fe   :  { %5725 = vmatpush3.msra.mxu1 %v6436_v6  ;;  %5721 = vmatprep.mubr.msk.f32.mxu0 %vm137_vm0, %v5955_v60  ;;  %v5958_v6 = vld [vmem:[#allocation3 + $0x40] sm:$0xff]  ;;  %v5979_v60 = vld [vmem:[#allocation3 + $0xe8] sm:$0xff] }
 0x4ff   :  { %5726 = vmatprep.subr.mxu1 %v6445_v7 }
 0x500   :  { %5727 = vmatpush3.msra.mxu1 %v6445_v7  ;;  %5722 = vmatmul.mubr.msk.f32.gmra.mxu0 %vm137_vm0, %v5956_v20  ;;  %v7116_v7 = vld [vmem:[#allocation24_spill] sm:$0xff] }
 0x501   :  { %5708 = vmatmul.mubr.msk.f32.gmra.mxu1 %vm137_vm0, %v5957_v4  ;;  %5728 = vmatprep.subr.mxu1 %v6456_v38  ;;  %v5980_v4 = vld [vmem:[#allocation3 + $0xf0] sm:$0xff] }
 0x502   :  { %5729 = vmatpush3.msra.mxu1 %v6456_v38  ;;  %5732 = vmatprep.mubr.msk.f32.mxu1 %vm137_vm0, %v6783_v42  ;;  %v7117_v38 = vld [vmem:[#allocation25_spill] sm:$0xff] }
 0x503   :  { %5730 = vmatprep.subr.mxu1 %v6465_v39  ;;  %5746 = vmatprep.mubr.msk.f32.mxu0 %vm137_vm0, %v5958_v6  ;;  %v5981_v6 = vld [vmem:[#allocation3 + $0xf8] sm:$0xff] }
 0x504   :  { %5731 = vmatpush3.msra.mxu1 %v6465_v39  ;;  %v7118_v39 = vld [vmem:[#allocation26_spill] sm:$0xff] }
 0x505   :  { %5733 = vmatmul.mubr.msk.f32.vlgmr.msra.gmra.mxu1 %vm137_vm0, %v6785_v55  ;;  %5752 = vmatprep.subr.mxu1 %v6476_v47 }
 0x506   :  { %5735 = vmatprep.mubr.msk.f32.mxu1 %vm137_vm0, %v6797_v56  ;;  %5753 = vmatpush3.msra.mxu1 %v6476_v47  ;;  %v7119_v47 = vld [vmem:[#allocation27_spill] sm:$0xff] }
 0x507   :  { %5754 = vmatprep.subr.mxu1 %v6485_v48 }
 0x508   :  { %5755 = vmatpush3.msra.mxu1 %v6485_v48  ;;  %v7120_v48 = vld [vmem:[#allocation28_spill] sm:$0xff] }
 0x509   :  { %5736 = vmatmul.mubr.msk.f32.gmra.mxu1 %vm137_vm0, %v6799_v33  ;;  %5756 = vmatprep.subr.mxu1 %v6496_v50 }
 0x50a   :  { %5757 = vmatpush3.msra.mxu1 %v6496_v50  ;;  %5760 = vmatprep.mubr.msk.f32.mxu1 %vm137_vm0, %v6783_v42  ;;  %v7121_v50 = vld [vmem:[#allocation29_spill] sm:$0xff] }
 0x50b   :  { %5758 = vmatprep.subr.mxu1 %v6503_v51 }
 0x50c   :  { %5759 = vmatpush3.msra.mxu1 %v6503_v51  ;;  %v7122_v51 = vld [vmem:[#allocation30_spill] sm:$0xff] }
 0x50d   :  { %5761 = vmatmul.mubr.msk.f32.vlgmr.msra.gmra.mxu1 %vm137_vm0, %v6785_v55  ;;  %5780 = vmatprep.subr.mxu1 %v6514_v61 }
 0x50e   :  { %5763 = vmatprep.mubr.msk.f32.mxu1 %vm137_vm0, %v6797_v56  ;;  %5781 = vmatpush3.msra.mxu1 %v6514_v61  ;;  %v7123_v61 = vld [vmem:[#allocation31_spill] sm:$0xff] }
 0x50f   :  { %5782 = vmatprep.subr.mxu1 %v6521_v40 }
 0x510   :  { %5783 = vmatpush3.msra.mxu1 %v6521_v40  ;;  %v7124_v40 = vld [vmem:[#allocation32_spill] sm:$0xff] }
 0x511   :  { %5764 = vmatmul.mubr.msk.f32.gmra.mxu1 %vm137_vm0, %v6799_v33  ;;  %5784 = vmatprep.subr.mxu1 %v6532_v29 }
 0x512   :  { %5785 = vmatpush3.msra.mxu1 %v6532_v29  ;;  %5788 = vmatprep.mubr.msk.f32.mxu1 %vm137_vm0, %v6783_v42 }
 0x513   :  { %5786 = vmatprep.subr.mxu1 %v6539_v57 }
 0x514   :  { %5787 = vmatpush3.msra.mxu1 %v6539_v57 }
 0x515   :  { %5789 = vmatmul.mubr.msk.f32.vlgmr.msra.gmra.mxu1 %vm137_vm0, %v6785_v55  ;;  %5808 = vmatprep.subr.mxu1 %v6550_v35 }
 0x516   :  { %5791 = vmatprep.mubr.msk.f32.mxu1 %vm137_vm0, %v6797_v56  ;;  %5809 = vmatpush3.msra.mxu1 %v6550_v35 }
 0x517   :  { %5810 = vmatprep.subr.mxu1 %v6557_v27 }
 0x518   :  { %5811 = vmatpush3.msra.mxu1 %v6557_v27 }
 0x519   :  { %5792 = vmatmul.mubr.msk.f32.gmra.mxu1 %vm137_vm0, %v6799_v33  ;;  %5812 = vmatprep.subr.mxu1 %v6568_v26 }
 0x51a   :  { %5813 = vmatpush3.msra.mxu1 %v6568_v26  ;;  %5816 = vmatprep.mubr.msk.f32.mxu1 %vm137_vm0, %v6783_v42 }
 0x51b   :  { %5814 = vmatprep.subr.mxu1 %v6575_v62 }
 0x51c   :  { %5815 = vmatpush3.msra.mxu1 %v6575_v62 }
 0x51d   :  { %5817 = vmatmul.mubr.msk.f32.vlgmr.msra.gmra.mxu1 %vm137_vm0, %v6785_v55  ;;  %5836 = vmatprep.subr.mxu1 %v6586_v24 }
 0x51e   :  { %5819 = vmatprep.mubr.msk.f32.mxu1 %vm137_vm0, %v6797_v56  ;;  %5837 = vmatpush3.msra.mxu1 %v6586_v24 }
 0x51f   :  { %5838 = vmatprep.subr.mxu1 %v6593_v13 }
 0x520   :  { %5839 = vmatpush3.msra.mxu1 %v6593_v13 }
 0x521   :  { %5820 = vmatmul.mubr.msk.f32.gmra.mxu1 %vm137_vm0, %v6799_v33  ;;  %5840 = vmatprep.subr.mxu1 %v6604_v63 }
 0x522   :  { %5841 = vmatpush3.msra.mxu1 %v6604_v63  ;;  %5844 = vmatprep.mubr.msk.f32.mxu1 %vm137_vm0, %v6783_v42 }
 0x523   :  { %5842 = vmatprep.subr.mxu1 %v7116_v7 }
 0x524   :  { %5843 = vmatpush3.msra.mxu1 %v7116_v7  ;;  %v5982_v7 = vld [vmem:[#allocation3 + $0x100] sm:$0xff] }
 0x525   :  { %5845 = vmatmul.mubr.msk.f32.vlgmr.msra.gmra.mxu1 %vm137_vm0, %v6785_v55  ;;  %5864 = vmatprep.subr.mxu1 %v7117_v38 }
 0x526   :  { %5847 = vmatprep.mubr.msk.f32.mxu1 %vm137_vm0, %v6797_v56  ;;  %5865 = vmatpush3.msra.mxu1 %v7117_v38  ;;  %v5983_v38 = vld [vmem:[#allocation3 + $0x108] sm:$0xff] }
 0x527   :  { %5866 = vmatprep.subr.mxu1 %v7118_v39 }
 0x528   :  { %5867 = vmatpush3.msra.mxu1 %v7118_v39  ;;  %v5984_v39 = vld [vmem:[#allocation3 + $0x110] sm:$0xff] }
 0x529   :  { %5848 = vmatmul.mubr.msk.f32.gmra.mxu1 %vm137_vm0, %v6799_v33  ;;  %5868 = vmatprep.subr.mxu1 %v7119_v47 }
 0x52a   :  { %5869 = vmatpush3.msra.mxu1 %v7119_v47  ;;  %5872 = vmatprep.mubr.msk.f32.mxu1 %vm137_vm0, %v6783_v42  ;;  %v5985_v47 = vld [vmem:[#allocation3 + $0x118] sm:$0xff] }
 0x52b   :  { %5870 = vmatprep.subr.mxu1 %v7120_v48 }
 0x52c   :  { %5871 = vmatpush3.msra.mxu1 %v7120_v48  ;;  %v6013_v48 = vmov 0.0  }
 0x52d   :  { %5873 = vmatmul.mubr.msk.f32.vlgmr.msra.gmra.mxu1 %vm137_vm0, %v6785_v55  ;;  %5892 = vmatprep.subr.mxu1 %v7121_v50 }
 0x52e   :  { %5875 = vmatprep.mubr.msk.f32.mxu1 %vm137_vm0, %v6797_v56  ;;  %5893 = vmatpush3.msra.mxu1 %v7121_v50  ;;  %v4487_v50 = vld [vmem:[%s7026_s8 + $0x18] sm:$0xff] }
 0x52f   :  { %5894 = vmatprep.subr.mxu1 %v7122_v51 }
 0x530   :  { %5895 = vmatpush3.msra.mxu1 %v7122_v51  ;;  %v4486_v51 = vld [vmem:[%s7026_s8 + $0x10] sm:$0xff] }
 0x531   :  { %5876 = vmatmul.mubr.msk.f32.gmra.mxu1 %vm137_vm0, %v6799_v33  ;;  %5896 = vmatprep.subr.mxu1 %v7123_v61 }
 0x532   :  { %5897 = vmatpush3.msra.mxu1 %v7123_v61  ;;  %5900 = vmatprep.mubr.msk.f32.mxu1 %vm137_vm0, %v6783_v42  ;;  %v5969_v42 = vld [vmem:[#allocation3 + $0x98] sm:$0xff]  ;;  %v4485_v61 = vld [vmem:[%s7026_s8 + $0x8] sm:$0xff] }
 0x533   :  { %5898 = vmatprep.subr.mxu1 %v7124_v40 }
 0x534   :  { %5899 = vmatpush3.msra.mxu1 %v7124_v40  ;;  %v4484_v40 = vld [vmem:[%s7026_s8] sm:$0xff] }
 0x535   :  { %5901 = vmatmul.mubr.msk.f32.vlgmr.msra.gmra.mxu1 %vm137_vm0, %v6785_v55  ;;  %v5970_v55 = vld [vmem:[#allocation3 + $0xa0] sm:$0xff]  ;;  %5920 = vmatprep.subr.mxu1 %v6013_v48 }
 0x536   :  { %5903 = vmatprep.mubr.msk.f32.mxu1 %vm137_vm0, %v6797_v56  ;;  %5921 = vmatpush3.msra.mxu1 %v4487_v50  ;;  %v5986_v50 = vld [vmem:[%s7025_s7] ss:$0 sm:$0xff] }
 0x537   :  { %5922 = vmatprep.subr.mxu1 %v6013_v48 }
 0x538   :  { %5923 = vmatpush3.msra.mxu1 %v4486_v51 }
 0x539   :  { %5904 = vmatmul.mubr.msk.f32.gmra.mxu1 %vm137_vm0, %v6799_v33  ;;  %v5972_v33 = vld [vmem:[#allocation3 + $0xb0] sm:$0xff]  ;;  %5924 = vmatprep.subr.mxu1 %v6013_v48 }
 0x53a   :  { %5928 = vmatprep.mubr.msk.f32.mxu1 %vm6014_vm1, %v6013_v48  ;;  %5925 = vmatpush3.msra.mxu1 %v4485_v61 }
 0x53b   :  { %5926 = vmatprep.subr.mxu1 %v6013_v48 }
 0x53c   :  { %5927 = vmatpush3.msra.mxu1 %v4484_v40 }
 0x5bc   :  { %v6930_v29 = vpop.f32.mrf.mxu1 }
 0x5be   :  { %v6932_v57 = vpop.f32.mrf.mxu1 }
 0x5c1   :  { %v6934_v35 = vpop.f32.mrf.mxu1 }
 0x5c3   :  { %v6936_v27 = vpop.f32.mrf.mxu1 }
 0x5c5   :  { %v5734_v26 = vpop.f32.mrf.mxu1 }
 0x5c7   :  { %v3296_v62 = vpop.f32.mrf.mxu1 }
 0x5c9   :  { %v5737_v24 = vpop.f32.mrf.mxu1 }
 0x5ca   :  { %5738 = vmatprep.subr.mxu0 %v5737_v24 }
 0x5cb   :  { %v3306_v13 = vpop.f32.mrf.mxu1  ;;  %5739 = vmatpush3.msra.mxu0 %v5737_v24 }
 0x5cc   :  { %5740 = vmatprep.subr.mxu0 %v3306_v13 }
 0x5cd   :  { %5741 = vmatpush3.msra.mxu0 %v3306_v13  ;;  %v5762_v63 = vpop.f32.mrf.mxu1 }
 0x5ce   :  { %5742 = vmatprep.subr.mxu0 %v5734_v26 }
 0x5cf   :  { %5743 = vmatpush3.msra.mxu0 %v5734_v26  ;;  %v3470_v25 = vpop.f32.mrf.mxu1  ;;  %v4581_v26 = vld [vmem:[%s7028_s10 + $0x18] sm:$0xff] }
 0x5d0   :  { %5744 = vmatprep.subr.mxu0 %v3296_v62 }
 0x5d1   :  { %5745 = vmatpush3.msra.mxu0 %v3296_v62  ;;  %v5765_v52 = vpop.f32.mrf.mxu1  ;;  %v5720_v62 = vpop.f32.mrf.mxu0 }
 0x5d2   :  { %5747 = vmatmul.mubr.msk.f32.vlgmr.msra.gmra.mxu0 %vm137_vm0, %v5959_v22  ;;  %5766 = vmatprep.subr.mxu0 %v5765_v52 }
 0x5d3   :  { %v3480_v30 = vpop.f32.mrf.mxu1  ;;  %5767 = vmatpush3.msra.mxu0 %v5765_v52  ;;  %5749 = vmatprep.mubr.msk.f32.mxu0 %vm137_vm0, %v5960_v31  ;;  %v3211_v24 = vpop.f32.mrf.mxu0 }
 0x5d4   :  { %5768 = vmatprep.subr.mxu0 %v3480_v30 }
 0x5d5   :  { %5769 = vmatpush3.msra.mxu0 %v3480_v30  ;;  %v5790_v45 = vpop.f32.mrf.mxu1  ;;  %v5723_v13 = vpop.f32.mrf.mxu0 }
 0x5d6   :  { %5750 = vmatmul.mubr.msk.f32.gmra.mxu0 %vm137_vm0, %v5961_v36  ;;  %5770 = vmatprep.subr.mxu0 %v5762_v63 }
 0x5d7   :  { %5771 = vmatpush3.msra.mxu0 %v5762_v63  ;;  %v3644_v19 = vpop.f32.mrf.mxu1  ;;  %5774 = vmatprep.mubr.msk.f32.mxu0 %vm137_vm0, %v5962_v9  ;;  %v3221_v63 = vpop.f32.mrf.mxu0 }
 0x5d8   :  { %5772 = vmatprep.subr.mxu0 %v3470_v25 }
 0x5d9   :  { %5773 = vmatpush3.msra.mxu0 %v3470_v25  ;;  %v5793_v34 = vpop.f32.mrf.mxu1 }
 0x5da   :  { %5775 = vmatmul.mubr.msk.f32.vlgmr.msra.gmra.mxu0 %vm137_vm0, %v5963_v53  ;;  %5794 = vmatprep.subr.mxu0 %v5793_v34 }
 0x5db   :  { %v3654_v49 = vpop.f32.mrf.mxu1  ;;  %5795 = vmatpush3.msra.mxu0 %v5793_v34  ;;  %5777 = vmatprep.mubr.msk.f32.mxu0 %vm137_vm0, %v5964_v43 }
 0x5dc   :  { %5796 = vmatprep.subr.mxu0 %v3654_v49 }
 0x5dd   :  { %5797 = vmatpush3.msra.mxu0 %v3654_v49  ;;  %v5818_v32 = vpop.f32.mrf.mxu1 }
 0x5de   :  { %5778 = vmatmul.mubr.msk.f32.gmra.mxu0 %vm137_vm0, %v5965_v28  ;;  %5798 = vmatprep.subr.mxu0 %v5790_v45 }
 0x5df   :  { %5799 = vmatpush3.msra.mxu0 %v5790_v45  ;;  %v3818_v18 = vpop.f32.mrf.mxu1  ;;  %5802 = vmatprep.mubr.msk.f32.mxu0 %vm137_vm0, %v5966_v11 }
 0x5e0   :  { %5800 = vmatprep.subr.mxu0 %v3644_v19 }
 0x5e1   :  { %5801 = vmatpush3.msra.mxu0 %v3644_v19  ;;  %v5821_v59 = vpop.f32.mrf.mxu1 }
 0x5e2   :  { %5803 = vmatmul.mubr.msk.f32.vlgmr.msra.gmra.mxu0 %vm137_vm0, %v5967_v10  ;;  %5822 = vmatprep.subr.mxu0 %v5821_v59  ;;  %v3217_v10 = vadd.f32 %v5720_v62, %v6930_v29 }
 0x5e3   :  { %v3828_v3 = vpop.f32.mrf.mxu1  ;;  %5823 = vmatpush3.msra.mxu0 %v5821_v59  ;;  %5805 = vmatprep.mubr.msk.f32.mxu0 %vm137_vm0, %v5968_v46  ;;  %v3212_v46 = vadd.f32 %v3211_v24, %v6932_v57 }
 0x5e4   :  { %5824 = vmatprep.subr.mxu0 %v3828_v3 }
 0x5e5   :  { %5825 = vmatpush3.msra.mxu0 %v3828_v3  ;;  %v5846_v1 = vpop.f32.mrf.mxu1 }
 0x5e6   :  { %5806 = vmatmul.mubr.msk.f32.gmra.mxu0 %vm137_vm0, %v5969_v42  ;;  %5826 = vmatprep.subr.mxu0 %v5818_v32 }
 0x5e7   :  { %5827 = vmatpush3.msra.mxu0 %v5818_v32  ;;  %v3992_v54 = vpop.f32.mrf.mxu1  ;;  %5830 = vmatprep.mubr.msk.f32.mxu0 %vm137_vm0, %v5970_v55 }
 0x5e8   :  { %5828 = vmatprep.subr.mxu0 %v3818_v18 }
 0x5e9   :  { %5829 = vmatpush3.msra.mxu0 %v3818_v18  ;;  %v5849_v21 = vpop.f32.mrf.mxu1 }
 0x5ea   :  { %5831 = vmatmul.mubr.msk.f32.vlgmr.msra.gmra.mxu0 %vm137_vm0, %v5971_v58  ;;  %5850 = vmatprep.subr.mxu0 %v5849_v21 }
 0x5eb   :  { %v4002_v56 = vpop.f32.mrf.mxu1  ;;  %5851 = vmatpush3.msra.mxu0 %v5849_v21  ;;  %5833 = vmatprep.mubr.msk.f32.mxu0 %vm137_vm0, %v5972_v33 }
 0x5ec   :  { %5852 = vmatprep.subr.mxu0 %v4002_v56 }
 0x5ed   :  { %5853 = vmatpush3.msra.mxu0 %v4002_v56  ;;  %v5874_v5 = vpop.f32.mrf.mxu1  ;;  %v3222_v56 = vadd.f32 %v3221_v63, %v6936_v27 }
 0x5ee   :  { %5834 = vmatmul.mubr.msk.f32.gmra.mxu0 %vm137_vm0, %v5973_v12  ;;  %5854 = vmatprep.subr.mxu0 %v5846_v1 }
 0x5ef   :  { %5855 = vmatpush3.msra.mxu0 %v5846_v1  ;;  %v4166_v14 = vpop.f32.mrf.mxu1  ;;  %5858 = vmatprep.mubr.msk.f32.mxu0 %vm137_vm0, %v5974_v16 }
 0x5f0   :  { %5856 = vmatprep.subr.mxu0 %v3992_v54 }
 0x5f1   :  { %5857 = vmatpush3.msra.mxu0 %v3992_v54  ;;  %v5877_v37 = vpop.f32.mrf.mxu1  ;;  %v3227_v54 = vadd.f32 %v5723_v13, %v6934_v35 }
 0x5f2   :  { %5859 = vmatmul.mubr.msk.f32.vlgmr.msra.gmra.mxu0 %vm137_vm0, %v5975_v41  ;;  %5878 = vmatprep.subr.mxu0 %v5877_v37 }
 0x5f3   :  { %v4176_v23 = vpop.f32.mrf.mxu1  ;;  %5879 = vmatpush3.msra.mxu0 %v5877_v37  ;;  %5861 = vmatprep.mubr.msk.f32.mxu0 %vm137_vm0, %v5976_v44 }
 0x5f4   :  { %5880 = vmatprep.subr.mxu0 %v4176_v23 }
 0x5f5   :  { %5881 = vmatpush3.msra.mxu0 %v4176_v23  ;;  %v5902_v0 = vpop.f32.mrf.mxu1 }
 0x5f6   :  { %5862 = vmatmul.mubr.msk.f32.gmra.mxu0 %vm137_vm0, %v5977_v15  ;;  %5882 = vmatprep.subr.mxu0 %v5874_v5 }
 0x5f7   :  { %5883 = vmatpush3.msra.mxu0 %v5874_v5  ;;  %v4340_v17 = vpop.f32.mrf.mxu1  ;;  %5886 = vmatprep.mubr.msk.f32.mxu0 %vm137_vm0, %v5978_v2 }
 0x5f8   :  { %5884 = vmatprep.subr.mxu0 %v4166_v14 }
 0x5f9   :  { %5885 = vmatpush3.msra.mxu0 %v4166_v14  ;;  %v5905_v8 = vpop.f32.mrf.mxu1 }
 0x5fa   :  { %5887 = vmatmul.mubr.msk.f32.vlgmr.msra.gmra.mxu0 %vm137_vm0, %v5979_v60  ;;  %5906 = vmatprep.subr.mxu0 %v5905_v8 }
 0x5fb   :  { %v4350_v20 = vpop.f32.mrf.mxu1  ;;  %5907 = vmatpush3.msra.mxu0 %v5905_v8  ;;  %5889 = vmatprep.mubr.msk.f32.mxu0 %vm137_vm0, %v5980_v4 }
 0x5fc   :  { %5908 = vmatprep.subr.mxu0 %v4350_v20 }
 0x5fd   :  { %5909 = vmatpush3.msra.mxu0 %v4350_v20 }
 0x5fe   :  { %5890 = vmatmul.mubr.msk.f32.gmra.mxu0 %vm137_vm0, %v5981_v6  ;;  %5910 = vmatprep.subr.mxu0 %v5902_v0 }
 0x5ff   :  { %5911 = vmatpush3.msra.mxu0 %v5902_v0  ;;  %5914 = vmatprep.mubr.msk.f32.mxu0 %vm137_vm0, %v5982_v7 }
 0x600   :  { %5912 = vmatprep.subr.mxu0 %v4340_v17 }
 0x601   :  { %5913 = vmatpush3.msra.mxu0 %v4340_v17 }
 0x602   :  { %5915 = vmatmul.mubr.msk.f32.vlgmr.msra.gmra.mxu0 %vm137_vm0, %v5983_v38  ;;  %5931 = vmatprep.subr.mxu0 %v6013_v48 }
 0x603   :  { %5917 = vmatprep.mubr.msk.f32.mxu0 %vm137_vm0, %v5984_v39  ;;  %5932 = vmatpush3.msra.mxu0 %v4581_v26 }
 0x604   :  { %5933 = vmatprep.subr.mxu0 %v6013_v48 }
 0x606   :  { %5918 = vmatmul.mubr.msk.f32.gmra.mxu0 %vm137_vm0, %v5985_v47 }
 0x607   :  { %5939 = vmatprep.mubr.msk.f32.mxu0 %vm6014_vm1, %v6013_v48 }
 0x692   :  { %v5748_v25 = vpop.f32.mrf.mxu0 }
 0x693   :  { %v3401_v1 = vadd.f32 %v5748_v25, %v3217_v10 }
 0x694   :  { %v3381_v52 = vpop.f32.mrf.mxu0 }
 0x695   :  { %v3400_v55 = vadd.f32 %v3381_v52, %v3212_v46 }
 0x696   :  { %v5751_v22 = vpop.f32.mrf.mxu0 }
 0x697   :  { %v3403_v33 = vadd.f32 %v5751_v22, %v3227_v54 }
 0x698   :  { %v3391_v30 = vpop.f32.mrf.mxu0 }
 0x699   :  { %v3402_v16 = vadd.f32 %v3391_v30, %v3222_v56 }
 0x69a   :  { %v5776_v31 = vpop.f32.mrf.mxu0 }
 0x69b   :  { %v3575_v21 = vadd.f32 %v5776_v31, %v3401_v1 }
 0x69c   :  { %v3555_v45 = vpop.f32.mrf.mxu0 }
 0x69d   :  { %v3574_v5 = vadd.f32 %v3555_v45, %v3400_v55 }
 0x69e   :  { %v5779_v36 = vpop.f32.mrf.mxu0 }
 0x69f   :  { %v3577_v37 = vadd.f32 %v5779_v36, %v3403_v33 }
 0x6a0   :  { %v3565_v19 = vpop.f32.mrf.mxu0 }
 0x6a1   :  { %v3576_v44 = vadd.f32 %v3565_v19, %v3402_v16 }
 0x6a2   :  { %v5804_v9 = vpop.f32.mrf.mxu0 }
 0x6a3   :  { %v3749_v12 = vadd.f32 %v5804_v9, %v3575_v21 }
 0x6a4   :  { %v3729_v34 = vpop.f32.mrf.mxu0 }
 0x6a5   :  { %v3748_v41 = vadd.f32 %v3729_v34, %v3574_v5 }
 0x6a6   :  { %v5807_v53 = vpop.f32.mrf.mxu0 }
 0x6a7   :  { %v3751_v57 = vadd.f32 %v5807_v53, %v3577_v37 }
 0x6a8   :  { %v3739_v49 = vpop.f32.mrf.mxu0 }
 0x6a9   :  { %v3750_v35 = vadd.f32 %v3739_v49, %v3576_v44  ;;  %v4580_v44 = vld [vmem:[%s7028_s10 + $0x10] sm:$0xff] }
 0x6aa   :  { %v5832_v43 = vpop.f32.mrf.mxu0  ;;  %5934 = vmatpush3.msra.mxu0 %v4580_v44 }
 0x6ab   :  { %v3923_v29 = vadd.f32 %v5832_v43, %v3749_v12  ;;  %5935 = vmatprep.subr.mxu0 %v6013_v48 }
 0x6ac   :  { %v3903_v32 = vpop.f32.mrf.mxu0 }
 0x6ad   :  { %v3922_v0 = vadd.f32 %v3903_v32, %v3748_v41 }
 0x6ae   :  { %v5835_v28 = vpop.f32.mrf.mxu0 }
 0x6af   :  { %v3925_v2 = vadd.f32 %v5835_v28, %v3751_v57  ;;  %v4579_v57 = vld [vmem:[%s7028_s10 + $0x8] sm:$0xff] }
 0x6b0   :  { %v3913_v18 = vpop.f32.mrf.mxu0  ;;  %5936 = vmatpush3.msra.mxu0 %v4579_v57 }
 0x6b1   :  { %v3924_v27 = vadd.f32 %v3913_v18, %v3750_v35  ;;  %5937 = vmatprep.subr.mxu0 %v6013_v48 }
 0x6b2   :  { %v5860_v11 = vpop.f32.mrf.mxu0 }
 0x6b3   :  { %v4097_v15 = vadd.f32 %v5860_v11, %v3923_v29 }
 0x6b4   :  { %v4077_v59 = vpop.f32.mrf.mxu0 }
 0x6b5   :  { %v4096_v8 = vadd.f32 %v4077_v59, %v3922_v0  ;;  %v4578_v0 = vld [vmem:[%s7028_s10] sm:$0xff] }
 0x6b6   :  { %v5863_v3 = vpop.f32.mrf.mxu0  ;;  %5938 = vmatpush3.msra.mxu0 %v4578_v0 }
 0x6b7   :  { %v4099_v4 = vadd.f32 %v5863_v3, %v3925_v2 }
 0x6b8   :  { %v4087_v42 = vpop.f32.mrf.mxu0 }
 0x6b9   :  { %v4098_v39 = vadd.f32 %v4087_v42, %v3924_v27 }
 0x6ba   :  { %v5888_v58 = vpop.f32.mrf.mxu0 }
 0x6bb   :  { %v4271_v60 = vadd.f32 %v5888_v58, %v4097_v15  ;;  %v4916_v15 = vld [vmem:[%s7027_s9] ss:$0 sm:$0xff] }
 0x6bc   :  { %v4251_v14 = vpop.f32.mrf.mxu0 }
 0x6bd   :  { %v4270_v6 = vadd.f32 %v4251_v14, %v4096_v8 }
 0x6be   :  { %v5891_v23 = vpop.f32.mrf.mxu0 }
 0x6bf   :  { %v4273_v47 = vadd.f32 %v5891_v23, %v4099_v4 }
 0x6c0   :  { %v4261_v17 = vpop.f32.mrf.mxu0 }
 0x6c1   :  { %v4272_v26 = vadd.f32 %v4261_v17, %v4098_v39 }
 0x6c2   :  { %v5916_v20 = vpop.f32.mrf.mxu0 }
 0x6c3   :  { %v4445_v7 = vadd.f32 %v5916_v20, %v4271_v60  ;;  %v4918_v60 = vld [vmem:[#allocation2] ss:$0 sm:$0xff] }
 0x6c4   :  { %v4425_v38 = vpop.f32.mrf.mxu0 }
 0x6c5   :  { %v4449_v51 = vadd.f32 %v5986_v50, %v4445_v7  ;;  %v4444_v61 = vadd.f32 %v4425_v38, %v4270_v6 }
 0x6c6   :  { %v5919_v40 = vpop.f32.mrf.mxu0 }
 0x6c7   :  { %v4453_v62 = vmax.f32 %v4449_v51, 0.0  ;;  %v4448_v24 = vadd.f32 %v5986_v50, %v4444_v61  ;;  %v4447_v13 = vadd.f32 %v5919_v40, %v4273_v47 }
 0x6c8   :  { %v4435_v63 = vpop.f32.mrf.mxu0 }
 0x6c9   :  { %v4463_v25 = vsel %vm137_vm0, %v4453_v62, -inf  ;;  %v4452_v52 = vmax.f32 %v4448_v24, 0.0  ;;  %v4451_v22 = vadd.f32 %v5986_v50, %v4447_v13  ;;  %v4446_v30 = vadd.f32 %v4435_v63, %v4272_v26 }
 0x6ca   :  { %v4464_v31 = vrot.slane %v4463_v25, 4 }
 0x6cb   :  { %v4456_v45 = vsel %vm137_vm0, %v4452_v52, -inf  ;;  %v4455_v36 = vmax.f32 %v4451_v22, 0.0  ;;  %v4450_v19 = vadd.f32 %v5986_v50, %v4446_v30 }
 0x6cc   :  { %v4465_v9 = vmax.f32 %v4463_v25, %v4464_v31  ;;  %v4457_v34 = vrot.slane %v4456_v45, 4 }
 0x6cd   :  { %v4477_v53 = vsel %vm137_vm0, %v4455_v36, -inf  ;;  %v4454_v49 = vmax.f32 %v4450_v19, 0.0 }
 0x6ce   :  { %v4466_v43 = vrot.slane %v4465_v9, 2  ;;  %v4458_v32 = vmax.f32 %v4456_v45, %v4457_v34  ;;  %v4478_v28 = vrot.slane %v4477_v53, 4 }
 0x6cf   :  { %v4470_v18 = vsel %vm137_vm0, %v4454_v49, -inf }
 0x6d0   :  { %v4467_v11 = vmax.f32 %v4465_v9, %v4466_v43  ;;  %v4459_v59 = vrot.slane %v4458_v32, 2  ;;  %v4479_v10 = vmax.f32 %v4477_v53, %v4478_v28  ;;  %v4471_v3 = vrot.slane %v4470_v18, 4 }
 0x6d2   :  { %v4468_v46 = vrot.slane %v4467_v11, 1  ;;  %v4460_v1 = vmax.f32 %v4458_v32, %v4459_v59  ;;  %v4480_v42 = vrot.slane %v4479_v10, 2  ;;  %v4472_v54 = vmax.f32 %v4470_v18, %v4471_v3 }
 0x6d4   :  { %v4461_v55 = vrot.slane %v4460_v1, 1  ;;  %v4481_v21 = vmax.f32 %v4479_v10, %v4480_v42  ;;  %v4473_v58 = vrot.slane %v4472_v54, 2  ;;  %v4469_v56 = vmax.f32 %v4467_v11, %v4468_v46 }
 0x6d6   :  { %v4462_v33 = vmax.f32 %v4460_v1, %v4461_v55  ;;  %v4474_v5 = vmax.f32 %v4472_v54, %v4473_v58  ;;  %v4482_v12 = vrot.slane %v4481_v21, 1 }
 0x6d8   :  { %v4475_v14 = vrot.slane %v4474_v5, 1  ;;  %v4500_v16 = vsel %vm4499_vm2, %v4469_v56, %v4462_v33  ;;  %v4483_v41 = vmax.f32 %v4481_v21, %v4482_v12 }
 0x6da   :  { %v4476_v37 = vmax.f32 %v4474_v5, %v4475_v14 }
 0x6dc   :  { %v4502_v29 = vsel %vm4501_vm3, %v4476_v37, %v4500_v16 }
 0x6dd   :  { %v4504_v23 = vsel %vm4503_vm4, %v4483_v41, %v4502_v29 }
 0x6de   :  { %5929 = vmatmul.mubr.msk.f32.vlgmr.msra.gmra.mxu1 %vm137_vm0, %v4504_v23 }
 0x79e   :  { %v4573_v17 = vpop.f32.mrf.mxu1 }
 0x79f   :  { %v4574_v35 = vadd.f32 %v4916_v15, %v4573_v17 }
 0x7a0   :  { %v5930_v2 = vpop.f32.mrf.mxu1 }
 0x7a1   :  { %v4577_v8 = vmax.f32 %v4574_v35, 0.0 }
 0x7a3   :  { %5940 = vmatmul.mubr.msk.f32.vlgmr.msra.gmra.mxu0 %vm137_vm0, %v4577_v8 }
 0x863   :  { %v4658_v20 = vpop.f32.mrf.mxu0 }
 0x864   :  { %v4659_v27 = vadd.f32 %v4918_v60, %v4658_v20 }
 0x865   :  { %v5941_v4 = vpop.f32.mrf.mxu0 }
 0x866   :  { %4663 = vst.msk [vmem:[%s7030_s12] sm:$0xf] %vm4662_vm5, %v4659_v27 }
 0x867   :  { %4668 = vsyncpa [#allocation4], 1 }

</bundles_post_ra>
